<compile_context>
chip_gen: v7x
topology: tpu7x:2x2x1
jax: 0.10.0
libtpu: 0.0.40
codegen_flags: <defaults>
</compile_context>

<pallas_src>
import math
import functools

import jax
import jax.numpy as jnp
from jax.experimental import pallas as pl
from jax.experimental.pallas import tpu as pltpu


# ------------------------------ kernel helpers --------------------------------
def _layer_norm(x, g, b, eps=1e-5):
    mu = jnp.mean(x, axis=-1, keepdims=True)
    var = jnp.mean((x - mu) ** 2, axis=-1, keepdims=True)
    return (x - mu) * jax.lax.rsqrt(var + eps) * g + b


# ------------------------------- Pallas kernel --------------------------------
def _encoder_layer_kernel(H, dh,
                          x_ref, mask_ref,
                          wqkv_ref, bqkv_ref, wo_ref, bo_ref,
                          ln1g_ref, ln1b_ref,
                          w1_ref, b1_ref, w2_ref, b2_ref,
                          ln2g_ref, ln2b_ref,
                          out_ref, attn_ref):
    B, S, D = x_ref.shape
    N = B * S
    BH = B * H

    x = x_ref[...]                                  # (B, S, D)
    xf = x.reshape(N, D)                            # merge leading dims (layout no-op)

    # ---- fused per-head Q/K/V projection: one head-batched einsum -------------
    xb = jnp.broadcast_to(x[:, None], (B, H, S, D)).reshape(BH, S, D)
    wqkv = jnp.broadcast_to(wqkv_ref[...][None], (B, H, D, 3 * dh)).reshape(BH, D, 3 * dh)
    bqkv = jnp.broadcast_to(bqkv_ref[...][None], (B, H, 1, 3 * dh)).reshape(BH, 1, 3 * dh)
    qkv = jnp.einsum('nsd,ndf->nsf', xb, wqkv,
                     preferred_element_type=jnp.float32) + bqkv      # (BH, S, 3dh)
    q = qkv[..., 0 * dh:1 * dh]
    k = qkv[..., 1 * dh:2 * dh]
    v = qkv[..., 2 * dh:3 * dh]

    # ---- scaled dot-product attention, all heads / batches at once ------------
    inv_scale = 1.0 / math.sqrt(float(dh))
    scores = jnp.einsum('nqd,nkd->nqk', q, k,
                        preferred_element_type=jnp.float32) * inv_scale   # (BH, S, S)

    mask = mask_ref[...]                            # (B, Mq, S), Mq in {1, S}
    Mq = mask.shape[1]
    masked = jnp.broadcast_to((mask != 0)[:, None, :, :],
                              (B, H, Mq, S)).reshape(BH, Mq, S)      # hoisted once
    scores = jnp.where(masked, jnp.float32(-10000.0), scores)

    scores = scores - jnp.max(scores, axis=-1, keepdims=True)
    e = jnp.exp(scores)
    prob = e * pl.reciprocal(jnp.sum(e, axis=-1, keepdims=True), approx=True)

    attn_ref[...] = prob.reshape(B, H, S, S)        # single (B,H,S,S) store

    ctx = jnp.einsum('nqk,nkd->nqd', prob, v,
                     preferred_element_type=jnp.float32)              # (BH, S, dh)

    # ---- output projection, folded per head then summed over heads ------------
    wo = jnp.broadcast_to(wo_ref[...][None], (B, H, dh, D)).reshape(BH, dh, D)
    attn_out = jnp.einsum('nsd,ndm->nsm', ctx, wo,
                          preferred_element_type=jnp.float32)         # (BH, S, D)
    attn_out = attn_out.reshape(B, H, S, D).sum(axis=1).reshape(N, D) + bo_ref[...]

    # ---- AddNorm #1 ------------------------------------------------------------
    h1 = _layer_norm(attn_out + xf, ln1g_ref[...], ln1b_ref[...])

    # ---- position-wise feed-forward (dropout = identity at inference) ---------
    ff = jnp.dot(h1, w1_ref[...], preferred_element_type=jnp.float32) + b1_ref[...]
    ff = jnp.maximum(ff, 0.0)
    ff = jnp.dot(ff, w2_ref[...], preferred_element_type=jnp.float32) + b2_ref[...]

    # ---- AddNorm #2 ------------------------------------------------------------
    out_ref[...] = _layer_norm(ff + h1, ln2g_ref[...], ln2b_ref[...]).reshape(B, S, D)


# --------------------------------- wrapper -------------------------------------
def transformer_encoder_layer(x, attn_mask, params, num_heads):
    """x: (B, S, D) f32; attn_mask: (B, 1, S) or (B, S, S) int32 (nonzero = masked)."""
    B, S, D = x.shape
    H = num_heads
    assert D % H == 0, "d_model must be divisible by num_heads"
    assert S % 8 == 0, "pad sequence length to a multiple of 8 (sublane tiling)"
    assert attn_mask.ndim == 3 and attn_mask.shape[0] == B and attn_mask.shape[2] == S
    dh = D // H
    F = params["w1"].shape[1]

    # ---- host-side weight re-layout (plain JAX, outside the kernel) -----------
    def per_head_cols(w):                       # (D, H*dh) -> (H, D, dh)
        return w.reshape(D, H, dh).transpose(1, 0, 2)

    def per_head_bias(b):                       # (1, H*dh) -> (H, 1, dh)
        return b.reshape(1, H, dh).transpose(1, 0, 2)

    wqkv_h = jnp.concatenate([per_head_cols(params["wq"]),
                              per_head_cols(params["wk"]),
                              per_head_cols(params["wv"])], axis=-1)   # (H, D, 3dh)
    bqkv_h = jnp.concatenate([per_head_bias(params["bq"]),
                              per_head_bias(params["bk"]),
                              per_head_bias(params["bv"])], axis=-1)   # (H, 1, 3dh)
    wo_h = params["wo"].reshape(H, dh, D)                              # (H, dh, D)

    kernel = functools.partial(_encoder_layer_kernel, H, dh)

    def full_spec(shape):
        nd = len(shape)
        return pl.BlockSpec(shape, lambda i, nd=nd: (0,) * nd)

    args = (
        x, attn_mask,
        wqkv_h, bqkv_h, wo_h, params["bo"],
        params["ln1_g"], params["ln1_b"],
        params["w1"], params["b1"], params["w2"], params["b2"],
        params["ln2_g"], params["ln2_b"],
    )
    in_specs = [full_spec(a.shape) for a in args]
    out_specs = [full_spec((B, S, D)), full_spec((B, H, S, S))]
    out_shape = [
        jax.ShapeDtypeStruct((B, S, D), jnp.float32),
        jax.ShapeDtypeStruct((B, H, S, S), jnp.float32),
    ]

    grid_spec = pltpu.PrefetchScalarGridSpec(
        num_scalar_prefetch=0,
        grid=(1,),                       # whole (flattened) batch in one step
        in_specs=in_specs,
        out_specs=out_specs,
    )

    flops = (2 * B * S * D * 3 * D            # fused QKV projection
             + 4 * B * H * S * S * dh         # scores + context
             + 2 * B * S * D * D              # output projection
             + 4 * B * S * D * F)             # feed-forward
    transcendentals = B * H * S * S + 2 * B * S
    bytes_accessed = (sum(int(a.size) * a.dtype.itemsize for a in args)
                      + 4 * (B * S * D + B * H * S * S))

    fn = pl.pallas_call(
        kernel,
        grid_spec=grid_spec,
        out_shape=out_shape,
        cost_estimate=pl.CostEstimate(flops=flops,
                                      transcendentals=transcendentals,
                                      bytes_accessed=bytes_accessed),
        compiler_params=pltpu.CompilerParams(
            dimension_semantics=("arbitrary",)),
    )
    out, attn_prob = fn(*args)
    return out, attn_prob


# ----------------------------- pure-JAX reference ------------------------------
def reference(x, attn_mask, params, num_heads):
    B, S, D = x.shape
    d_head = D // num_heads

    def proj(a, w, b):
        return a @ w + b[0]

    q = proj(x, params["wq"], params["bq"]).reshape(B, S, num_heads, d_head).transpose(0, 2, 1, 3)
    k = proj(x, params["wk"], params["bk"]).reshape(B, S, num_heads, d_head).transpose(0, 2, 1, 3)
    v = proj(x, params["wv"], params["bv"]).reshape(B, S, num_heads, d_head).transpose(0, 2, 1, 3)
    scores = jnp.einsum("bhqd,bhkd->bhqk", q, k) / math.sqrt(d_head)
    mask = (attn_mask != 0)[:, None, :, :]
    scores = jnp.where(mask, -10000.0, scores)
    prob = jax.nn.softmax(scores, axis=-1)
    ctx = jnp.einsum("bhqk,bhkd->bhqd", prob, v).transpose(0, 2, 1, 3).reshape(B, S, D)
    attn_out = proj(ctx, params["wo"], params["bo"])

    def ln(a, g, b):
        mu = a.mean(-1, keepdims=True)
        var = ((a - mu) ** 2).mean(-1, keepdims=True)
        return (a - mu) * jax.lax.rsqrt(var + 1e-5) * g[0] + b[0]

    h1 = ln(attn_out + x, params["ln1_g"], params["ln1_b"])
    ff = jnp.maximum(proj(h1, params["w1"], params["b1"]), 0.0)
    ff = proj(ff, params["w2"], params["b2"])
    out = ln(ff + h1, params["ln2_g"], params["ln2_b"])
    return out, prob


# ------------------------------------ main --------------------------------------
if __name__ == "__main__":
    B, S, D, H, F = 2, 8, 32, 4, 64   # batch, seq, d_model, heads, feed_forward_dim
    key = jax.random.PRNGKey(0)
    ks = jax.random.split(key, 12)

    init = lambda k, shape, scale: (jax.random.normal(k, shape, jnp.float32) * scale)
    params = {
        "wq": init(ks[0], (D, D), 0.05), "bq": init(ks[1], (1, D), 0.01),
        "wk": init(ks[2], (D, D), 0.05), "bk": init(ks[3], (1, D), 0.01),
        "wv": init(ks[4], (D, D), 0.05), "bv": init(ks[5], (1, D), 0.01),
        "wo": init(ks[6], (D, D), 0.05), "bo": init(ks[7], (1, D), 0.01),
        "ln1_g": jnp.ones((1, D), jnp.float32), "ln1_b": jnp.zeros((1, D), jnp.float32),
        "w1": init(ks[8], (D, F), 0.05), "b1": init(ks[9], (1, F), 0.01),
        "w2": init(ks[10], (F, D), 0.05), "b2": init(ks[11], (1, D), 0.01),
        "ln2_g": jnp.ones((1, D), jnp.float32), "ln2_b": jnp.zeros((1, D), jnp.float32),
    }

    xk, mk = jax.random.split(jax.random.PRNGKey(42))
    x = jax.random.normal(xk, (B, S, D), jnp.float32)
    # padding mask over key positions (~20% masked), passed compactly as (B, 1, S)
    attn_mask = (jax.random.uniform(mk, (B, 1, S)) < 0.2).astype(jnp.int32)

    out, attn_prob = transformer_encoder_layer(x, attn_mask, params, H)
    out = jax.block_until_ready(out)
    attn_prob = jax.block_until_ready(attn_prob)

    ref_out, ref_prob = reference(x, attn_mask, params, H)
    assert out.shape == (B, S, D) and attn_prob.shape == (B, H, S, S)
    assert jnp.allclose(out, ref_out, rtol=2e-3, atol=2e-3)
    assert jnp.allclose(attn_prob, ref_prob, rtol=2e-3, atol=2e-3)

    print("KERNEL_OK")
</pallas_src>

<mosaic_0001>
module attributes {stable_mosaic.version = 11 : i64} {
  func.func @_encoder_layer_kernel(%arg0: i32, %arg1: memref<2x8x32xf32, #tpu.memory_space<vmem>>, %arg2: memref<2x1x8xi32, #tpu.memory_space<vmem>>, %arg3: memref<4x32x24xf32, #tpu.memory_space<vmem>>, %arg4: memref<4x1x24xf32, #tpu.memory_space<vmem>>, %arg5: memref<4x8x32xf32, #tpu.memory_space<vmem>>, %arg6: memref<1x32xf32, #tpu.memory_space<vmem>>, %arg7: memref<1x32xf32, #tpu.memory_space<vmem>>, %arg8: memref<1x32xf32, #tpu.memory_space<vmem>>, %arg9: memref<32x64xf32, #tpu.memory_space<vmem>>, %arg10: memref<1x64xf32, #tpu.memory_space<vmem>>, %arg11: memref<64x32xf32, #tpu.memory_space<vmem>>, %arg12: memref<1x32xf32, #tpu.memory_space<vmem>>, %arg13: memref<1x32xf32, #tpu.memory_space<vmem>>, %arg14: memref<1x32xf32, #tpu.memory_space<vmem>>, %arg15: memref<2x8x32xf32, #tpu.memory_space<vmem>>, %arg16: memref<2x4x8x8xf32, #tpu.memory_space<vmem>>) attributes {dimension_semantics = [#tpu.dimension_semantics<arbitrary>], iteration_bounds = array<i64: 1>, scalar_prefetch = 0 : i64, scratch_operands = 0 : i64, tpu.core_type = #tpu.core_type<tc>, window_params = [{pipeline_mode = #tpu.pipeline_mode<synchronous>, transform_indices = @transform_0, window_bounds = array<i64: 2, 8, 32>}, {pipeline_mode = #tpu.pipeline_mode<synchronous>, transform_indices = @transform_1, window_bounds = array<i64: 2, 1, 8>}, {pipeline_mode = #tpu.pipeline_mode<synchronous>, transform_indices = @transform_2, window_bounds = array<i64: 4, 32, 24>}, {pipeline_mode = #tpu.pipeline_mode<synchronous>, transform_indices = @transform_3, window_bounds = array<i64: 4, 1, 24>}, {pipeline_mode = #tpu.pipeline_mode<synchronous>, transform_indices = @transform_4, window_bounds = array<i64: 4, 8, 32>}, {pipeline_mode = #tpu.pipeline_mode<synchronous>, transform_indices = @transform_5, window_bounds = array<i64: 1, 32>}, {pipeline_mode = #tpu.pipeline_mode<synchronous>, transform_indices = @transform_6, window_bounds = array<i64: 1, 32>}, {pipeline_mode = #tpu.pipeline_mode<synchronous>, transform_indices = @transform_7, window_bounds = array<i64: 1, 32>}, {pipeline_mode = #tpu.pipeline_mode<synchronous>, transform_indices = @transform_8, window_bounds = array<i64: 32, 64>}, {pipeline_mode = #tpu.pipeline_mode<synchronous>, transform_indices = @transform_9, window_bounds = array<i64: 1, 64>}, {pipeline_mode = #tpu.pipeline_mode<synchronous>, transform_indices = @transform_10, window_bounds = array<i64: 64, 32>}, {pipeline_mode = #tpu.pipeline_mode<synchronous>, transform_indices = @transform_11, window_bounds = array<i64: 1, 32>}, {pipeline_mode = #tpu.pipeline_mode<synchronous>, transform_indices = @transform_12, window_bounds = array<i64: 1, 32>}, {pipeline_mode = #tpu.pipeline_mode<synchronous>, transform_indices = @transform_13, window_bounds = array<i64: 1, 32>}, {pipeline_mode = #tpu.pipeline_mode<synchronous>, transform_indices = @transform_14, window_bounds = array<i64: 2, 8, 32>}, {pipeline_mode = #tpu.pipeline_mode<synchronous>, transform_indices = @transform_15, window_bounds = array<i64: 2, 4, 8, 8>}]} {
    %c0 = arith.constant 0 : index
    %c0_0 = arith.constant 0 : index
    %c0_1 = arith.constant 0 : index
    %0 = vector.load %arg1[%c0, %c0_0, %c0_1] : memref<2x8x32xf32, #tpu.memory_space<vmem>>, vector<2x8x32xf32>
    %1 = vector.shape_cast %0 : vector<2x8x32xf32> to vector<16x32xf32>
    %2 = vector.shape_cast %0 : vector<2x8x32xf32> to vector<2x1x8x32xf32>
    %3 = vector.shape_cast %2 : vector<2x1x8x32xf32> to vector<2x1x8x32xf32>
    %4 = vector.broadcast %3 : vector<2x1x8x32xf32> to vector<2x4x8x32xf32>
    %5 = vector.shape_cast %4 : vector<2x4x8x32xf32> to vector<8x8x32xf32>
    %c0_2 = arith.constant 0 : index
    %c0_3 = arith.constant 0 : index
    %c0_4 = arith.constant 0 : index
    %6 = vector.load %arg3[%c0_2, %c0_3, %c0_4] : memref<4x32x24xf32, #tpu.memory_space<vmem>>, vector<4x32x24xf32>
    %7 = vector.shape_cast %6 : vector<4x32x24xf32> to vector<1x4x32x24xf32>
    %8 = vector.shape_cast %7 : vector<1x4x32x24xf32> to vector<1x4x32x24xf32>
    %9 = vector.broadcast %8 : vector<1x4x32x24xf32> to vector<2x4x32x24xf32>
    %10 = vector.shape_cast %9 : vector<2x4x32x24xf32> to vector<8x32x24xf32>
    %c0_5 = arith.constant 0 : index
    %c0_6 = arith.constant 0 : index
    %c0_7 = arith.constant 0 : index
    %11 = vector.load %arg4[%c0_5, %c0_6, %c0_7] : memref<4x1x24xf32, #tpu.memory_space<vmem>>, vector<4x1x24xf32>
    %12 = vector.shape_cast %11 : vector<4x1x24xf32> to vector<1x4x1x24xf32>
    %13 = vector.shape_cast %12 : vector<1x4x1x24xf32> to vector<1x4x1x24xf32>
    %14 = vector.broadcast %13 : vector<1x4x1x24xf32> to vector<2x4x1x24xf32>
    %15 = vector.shape_cast %14 : vector<2x4x1x24xf32> to vector<8x1x24xf32>
    "tpu.trace_start"() <{level = 10 : i32, message = "nsd,ndf->nsf"}> : () -> ()
    %cst = arith.constant dense<0.000000e+00> : vector<8x8x24xf32>
    %16 = tpu.matmul %5, %10, %cst {dimension_numbers = #tpu.dot_dimension_numbers<[2], [1], [1], [2], [0, 0, 0, 1, 1, 2], [0], [0]>} : vector<8x8x32xf32>, vector<8x32x24xf32>, vector<8x8x24xf32> -> vector<8x8x24xf32>
    "tpu.trace_stop"() : () -> ()
    %17 = vector.broadcast %15 : vector<8x1x24xf32> to vector<8x8x24xf32>
    %18 = arith.addf %16, %17 : vector<8x8x24xf32>
    %19 = vector.extract_strided_slice %18 {offsets = [0, 0, 0], sizes = [8, 8, 8], strides = [1, 1, 1]} : vector<8x8x24xf32> to vector<8x8x8xf32>
    %20 = vector.extract_strided_slice %18 {offsets = [0, 0, 8], sizes = [8, 8, 8], strides = [1, 1, 1]} : vector<8x8x24xf32> to vector<8x8x8xf32>
    %21 = vector.extract_strided_slice %18 {offsets = [0, 0, 16], sizes = [8, 8, 8], strides = [1, 1, 1]} : vector<8x8x24xf32> to vector<8x8x8xf32>
    "tpu.trace_start"() <{level = 10 : i32, message = "nqd,nkd->nqk"}> : () -> ()
    %cst_8 = arith.constant dense<0.000000e+00> : vector<8x8x8xf32>
    %22 = tpu.matmul %19, %20, %cst_8 {dimension_numbers = #tpu.dot_dimension_numbers<[2], [2], [1], [1], [0, 0, 0, 1, 1, 1], [0], [0]>} : vector<8x8x8xf32>, vector<8x8x8xf32>, vector<8x8x8xf32> -> vector<8x8x8xf32>
    "tpu.trace_stop"() : () -> ()
    %cst_9 = arith.constant 0.353553385 : f32
    %23 = vector.broadcast %cst_9 : f32 to vector<8x8x8xf32>
    %24 = arith.mulf %22, %23 : vector<8x8x8xf32>
    %c0_10 = arith.constant 0 : index
    %c0_11 = arith.constant 0 : index
    %c0_12 = arith.constant 0 : index
    %25 = vector.load %arg2[%c0_10, %c0_11, %c0_12] : memref<2x1x8xi32, #tpu.memory_space<vmem>>, vector<2x1x8xi32>
    %c0_i32 = arith.constant 0 : i32
    %26 = vector.broadcast %c0_i32 : i32 to vector<2x1x8xi32>
    %27 = arith.cmpi ne, %25, %26 : vector<2x1x8xi32>
    %28 = vector.shape_cast %27 : vector<2x1x8xi1> to vector<2x1x1x8xi1>
    %29 = vector.shape_cast %28 : vector<2x1x1x8xi1> to vector<2x1x1x8xi1>
    %30 = vector.broadcast %29 : vector<2x1x1x8xi1> to vector<2x4x1x8xi1>
    %31 = vector.shape_cast %30 : vector<2x4x1x8xi1> to vector<8x1x8xi1>
    %cst_13 = arith.constant -1.000000e+04 : f32
    %32 = vector.shape_cast %31 : vector<8x1x8xi1> to vector<8x1x8xi1>
    %33 = vector.broadcast %32 : vector<8x1x8xi1> to vector<8x8x8xi1>
    %34 = vector.broadcast %cst_13 : f32 to vector<8x8x8xf32>
    %35 = arith.select %33, %34, %24 : vector<8x8x8xi1>, vector<8x8x8xf32>
    %cst_14 = arith.constant dense<0xFF800000> : vector<8x8xf32>
    %36 = vector.multi_reduction <maximumf>, %35, %cst_14 [2] : vector<8x8x8xf32> to vector<8x8xf32>
    %37 = vector.shape_cast %36 : vector<8x8xf32> to vector<8x8x1xf32>
    %38 = vector.broadcast %37 : vector<8x8x1xf32> to vector<8x8x8xf32>
    %39 = arith.subf %35, %38 : vector<8x8x8xf32>
    %40 = math.exp %39 : vector<8x8x8xf32>
    %cst_15 = arith.constant dense<0.000000e+00> : vector<8x8xf32>
    %41 = vector.multi_reduction <add>, %40, %cst_15 [2] : vector<8x8x8xf32> to vector<8x8xf32>
    %42 = vector.shape_cast %41 : vector<8x8xf32> to vector<8x8x1xf32>
    %43 = tpu.reciprocal %42 {approx = true} : vector<8x8x1xf32> -> vector<8x8x1xf32>
    %44 = vector.broadcast %43 : vector<8x8x1xf32> to vector<8x8x8xf32>
    %45 = arith.mulf %40, %44 : vector<8x8x8xf32>
    %46 = vector.shape_cast %45 : vector<8x8x8xf32> to vector<2x4x8x8xf32>
    %c0_16 = arith.constant 0 : index
    %c0_17 = arith.constant 0 : index
    %c0_18 = arith.constant 0 : index
    %c0_19 = arith.constant 0 : index
    %47 = vector.load %arg16[%c0_16, %c0_17, %c0_18, %c0_19] : memref<2x4x8x8xf32, #tpu.memory_space<vmem>>, vector<2x4x8x8xf32>
    tpu.vector_store %arg16[%c0_16, %c0_17, %c0_18, %c0_19], %46 {strides = array<i32>} : memref<2x4x8x8xf32, #tpu.memory_space<vmem>>, vector<2x4x8x8xf32>,
    "tpu.trace_start"() <{level = 10 : i32, message = "nqk,nkd->nqd"}> : () -> ()
    %cst_20 = arith.constant dense<0.000000e+00> : vector<8x8x8xf32>
    %48 = tpu.matmul %45, %21, %cst_20 {dimension_numbers = #tpu.dot_dimension_numbers<[2], [1], [1], [2], [0, 0, 0, 1, 1, 2], [0], [0]>} : vector<8x8x8xf32>, vector<8x8x8xf32>, vector<8x8x8xf32> -> vector<8x8x8xf32>
    "tpu.trace_stop"() : () -> ()
    %c0_21 = arith.constant 0 : index
    %c0_22 = arith.constant 0 : index
    %c0_23 = arith.constant 0 : index
    %49 = vector.load %arg5[%c0_21, %c0_22, %c0_23] : memref<4x8x32xf32, #tpu.memory_space<vmem>>, vector<4x8x32xf32>
    %50 = vector.shape_cast %49 : vector<4x8x32xf32> to vector<1x4x8x32xf32>
    %51 = vector.shape_cast %50 : vector<1x4x8x32xf32> to vector<1x4x8x32xf32>
    %52 = vector.broadcast %51 : vector<1x4x8x32xf32> to vector<2x4x8x32xf32>
    %53 = vector.shape_cast %52 : vector<2x4x8x32xf32> to vector<8x8x32xf32>
    "tpu.trace_start"() <{level = 10 : i32, message = "nsd,ndm->nsm"}> : () -> ()
    %cst_24 = arith.constant dense<0.000000e+00> : vector<8x8x32xf32>
    %54 = tpu.matmul %48, %53, %cst_24 {dimension_numbers = #tpu.dot_dimension_numbers<[2], [1], [1], [2], [0, 0, 0, 1, 1, 2], [0], [0]>} : vector<8x8x8xf32>, vector<8x8x32xf32>, vector<8x8x32xf32> -> vector<8x8x32xf32>
    "tpu.trace_stop"() : () -> ()
    %55 = vector.shape_cast %54 : vector<8x8x32xf32> to vector<2x4x8x32xf32>
    %cst_25 = arith.constant dense<0.000000e+00> : vector<2x8x32xf32>
    %56 = vector.multi_reduction <add>, %55, %cst_25 [1] : vector<2x4x8x32xf32> to vector<2x8x32xf32>
    %57 = vector.shape_cast %56 : vector<2x8x32xf32> to vector<16x32xf32>
    %c0_26 = arith.constant 0 : index
    %c0_27 = arith.constant 0 : index
    %58 = vector.load %arg6[%c0_26, %c0_27] : memref<1x32xf32, #tpu.memory_space<vmem>>, vector<1x32xf32>
    %59 = vector.broadcast %58 : vector<1x32xf32> to vector<16x32xf32>
    %60 = arith.addf %57, %59 : vector<16x32xf32>
    %61 = arith.addf %60, %1 : vector<16x32xf32>
    %c0_28 = arith.constant 0 : index
    %c0_29 = arith.constant 0 : index
    %62 = vector.load %arg7[%c0_28, %c0_29] : memref<1x32xf32, #tpu.memory_space<vmem>>, vector<1x32xf32>
    %c0_30 = arith.constant 0 : index
    %c0_31 = arith.constant 0 : index
    %63 = vector.load %arg8[%c0_30, %c0_31] : memref<1x32xf32, #tpu.memory_space<vmem>>, vector<1x32xf32>
    %cst_32 = arith.constant dense<0.000000e+00> : vector<16xf32>
    %64 = vector.multi_reduction <add>, %61, %cst_32 [1] : vector<16x32xf32> to vector<16xf32>
    %65 = vector.shape_cast %64 : vector<16xf32> to vector<16x1xf32>
    %cst_33 = arith.constant 3.200000e+01 : f32
    %66 = vector.broadcast %cst_33 : f32 to vector<16x1xf32>
    %67 = arith.divf %65, %66 : vector<16x1xf32>
    %68 = vector.broadcast %67 : vector<16x1xf32> to vector<16x32xf32>
    %69 = arith.subf %61, %68 : vector<16x32xf32>
    %70 = arith.mulf %69, %69 : vector<16x32xf32>
    %cst_34 = arith.constant dense<0.000000e+00> : vector<16xf32>
    %71 = vector.multi_reduction <add>, %70, %cst_34 [1] : vector<16x32xf32> to vector<16xf32>
    %72 = vector.shape_cast %71 : vector<16xf32> to vector<16x1xf32>
    %cst_35 = arith.constant 3.200000e+01 : f32
    %73 = vector.broadcast %cst_35 : f32 to vector<16x1xf32>
    %74 = arith.divf %72, %73 : vector<16x1xf32>
    %75 = vector.broadcast %67 : vector<16x1xf32> to vector<16x32xf32>
    %76 = arith.subf %61, %75 : vector<16x32xf32>
    %cst_36 = arith.constant 9.99999974E-6 : f32
    %77 = vector.broadcast %cst_36 : f32 to vector<16x1xf32>
    %78 = arith.addf %74, %77 : vector<16x1xf32>
    %79 = math.rsqrt %78 : vector<16x1xf32>
    %80 = vector.broadcast %79 : vector<16x1xf32> to vector<16x32xf32>
    %81 = arith.mulf %76, %80 : vector<16x32xf32>
    %82 = vector.broadcast %62 : vector<1x32xf32> to vector<16x32xf32>
    %83 = arith.mulf %81, %82 : vector<16x32xf32>
    %84 = vector.broadcast %63 : vector<1x32xf32> to vector<16x32xf32>
    %85 = arith.addf %83, %84 : vector<16x32xf32>
    %c0_37 = arith.constant 0 : index
    %c0_38 = arith.constant 0 : index
    %86 = vector.load %arg9[%c0_37, %c0_38] : memref<32x64xf32, #tpu.memory_space<vmem>>, vector<32x64xf32>
    %cst_39 = arith.constant dense<0.000000e+00> : vector<16x64xf32>
    %87 = tpu.matmul %85, %86, %cst_39 {dimension_numbers = #tpu.dot_dimension_numbers<[1], [0], [0], [1], [0, 0, 1, 1], [], []>} : vector<16x32xf32>, vector<32x64xf32>, vector<16x64xf32> -> vector<16x64xf32>
    %c0_40 = arith.constant 0 : index
    %c0_41 = arith.constant 0 : index
    %88 = vector.load %arg10[%c0_40, %c0_41] : memref<1x64xf32, #tpu.memory_space<vmem>>, vector<1x64xf32>
    %89 = vector.broadcast %88 : vector<1x64xf32> to vector<16x64xf32>
    %90 = arith.addf %87, %89 : vector<16x64xf32>
    %cst_42 = arith.constant 0.000000e+00 : f32
    %91 = vector.broadcast %cst_42 : f32 to vector<16x64xf32>
    %92 = arith.maximumf %90, %91 : vector<16x64xf32>
    %c0_43 = arith.constant 0 : index
    %c0_44 = arith.constant 0 : index
    %93 = vector.load %arg11[%c0_43, %c0_44] : memref<64x32xf32, #tpu.memory_space<vmem>>, vector<64x32xf32>
    %cst_45 = arith.constant dense<0.000000e+00> : vector<16x32xf32>
    %94 = tpu.matmul %92, %93, %cst_45 {dimension_numbers = #tpu.dot_dimension_numbers<[1], [0], [0], [1], [0, 0, 1, 1], [], []>} : vector<16x64xf32>, vector<64x32xf32>, vector<16x32xf32> -> vector<16x32xf32>
    %c0_46 = arith.constant 0 : index
    %c0_47 = arith.constant 0 : index
    %95 = vector.load %arg12[%c0_46, %c0_47] : memref<1x32xf32, #tpu.memory_space<vmem>>, vector<1x32xf32>
    %96 = vector.broadcast %95 : vector<1x32xf32> to vector<16x32xf32>
    %97 = arith.addf %94, %96 : vector<16x32xf32>
    %98 = arith.addf %97, %85 : vector<16x32xf32>
    %c0_48 = arith.constant 0 : index
    %c0_49 = arith.constant 0 : index
    %99 = vector.load %arg13[%c0_48, %c0_49] : memref<1x32xf32, #tpu.memory_space<vmem>>, vector<1x32xf32>
    %c0_50 = arith.constant 0 : index
    %c0_51 = arith.constant 0 : index
    %100 = vector.load %arg14[%c0_50, %c0_51] : memref<1x32xf32, #tpu.memory_space<vmem>>, vector<1x32xf32>
    %cst_52 = arith.constant dense<0.000000e+00> : vector<16xf32>
    %101 = vector.multi_reduction <add>, %98, %cst_52 [1] : vector<16x32xf32> to vector<16xf32>
    %102 = vector.shape_cast %101 : vector<16xf32> to vector<16x1xf32>
    %cst_53 = arith.constant 3.200000e+01 : f32
    %103 = vector.broadcast %cst_53 : f32 to vector<16x1xf32>
    %104 = arith.divf %102, %103 : vector<16x1xf32>
    %105 = vector.broadcast %104 : vector<16x1xf32> to vector<16x32xf32>
    %106 = arith.subf %98, %105 : vector<16x32xf32>
    %107 = arith.mulf %106, %106 : vector<16x32xf32>
    %cst_54 = arith.constant dense<0.000000e+00> : vector<16xf32>
    %108 = vector.multi_reduction <add>, %107, %cst_54 [1] : vector<16x32xf32> to vector<16xf32>
    %109 = vector.shape_cast %108 : vector<16xf32> to vector<16x1xf32>
    %cst_55 = arith.constant 3.200000e+01 : f32
    %110 = vector.broadcast %cst_55 : f32 to vector<16x1xf32>
    %111 = arith.divf %109, %110 : vector<16x1xf32>
    %112 = vector.broadcast %104 : vector<16x1xf32> to vector<16x32xf32>
    %113 = arith.subf %98, %112 : vector<16x32xf32>
    %cst_56 = arith.constant 9.99999974E-6 : f32
    %114 = vector.broadcast %cst_56 : f32 to vector<16x1xf32>
    %115 = arith.addf %111, %114 : vector<16x1xf32>
    %116 = math.rsqrt %115 : vector<16x1xf32>
    %117 = vector.broadcast %116 : vector<16x1xf32> to vector<16x32xf32>
    %118 = arith.mulf %113, %117 : vector<16x32xf32>
    %119 = vector.broadcast %99 : vector<1x32xf32> to vector<16x32xf32>
    %120 = arith.mulf %118, %119 : vector<16x32xf32>
    %121 = vector.broadcast %100 : vector<1x32xf32> to vector<16x32xf32>
    %122 = arith.addf %120, %121 : vector<16x32xf32>
    %123 = vector.shape_cast %122 : vector<16x32xf32> to vector<2x8x32xf32>
    %c0_57 = arith.constant 0 : index
    %c0_58 = arith.constant 0 : index
    %c0_59 = arith.constant 0 : index
    %124 = vector.load %arg15[%c0_57, %c0_58, %c0_59] : memref<2x8x32xf32, #tpu.memory_space<vmem>>, vector<2x8x32xf32>
    tpu.vector_store %arg15[%c0_57, %c0_58, %c0_59], %123 {strides = array<i32>} : memref<2x8x32xf32, #tpu.memory_space<vmem>>, vector<2x8x32xf32>,
    return
  }
  func.func @transform_0(%arg0: i32) -> (i32, i32, i32) {
    %c0_i32 = arith.constant 0 : i32
    %c0_i32_0 = arith.constant 0 : i32
    %c0_i32_1 = arith.constant 0 : i32
    %c0_i32_2 = arith.constant 0 : i32
    return %c0_i32, %c0_i32_0, %c0_i32_1 : i32, i32, i32
  }
  func.func @transform_1(%arg0: i32) -> (i32, i32, i32) {
    %c0_i32 = arith.constant 0 : i32
    %c0_i32_0 = arith.constant 0 : i32
    %c0_i32_1 = arith.constant 0 : i32
    %c0_i32_2 = arith.constant 0 : i32
    return %c0_i32, %c0_i32_0, %c0_i32_1 : i32, i32, i32
  }
  func.func @transform_2(%arg0: i32) -> (i32, i32, i32) {
    %c0_i32 = arith.constant 0 : i32
    %c0_i32_0 = arith.constant 0 : i32
    %c0_i32_1 = arith.constant 0 : i32
    %c0_i32_2 = arith.constant 0 : i32
    return %c0_i32, %c0_i32_0, %c0_i32_1 : i32, i32, i32
  }
  func.func @transform_3(%arg0: i32) -> (i32, i32, i32) {
    %c0_i32 = arith.constant 0 : i32
    %c0_i32_0 = arith.constant 0 : i32
    %c0_i32_1 = arith.constant 0 : i32
    %c0_i32_2 = arith.constant 0 : i32
    return %c0_i32, %c0_i32_0, %c0_i32_1 : i32, i32, i32
  }
  func.func @transform_4(%arg0: i32) -> (i32, i32, i32) {
    %c0_i32 = arith.constant 0 : i32
    %c0_i32_0 = arith.constant 0 : i32
    %c0_i32_1 = arith.constant 0 : i32
    %c0_i32_2 = arith.constant 0 : i32
    return %c0_i32, %c0_i32_0, %c0_i32_1 : i32, i32, i32
  }
  func.func @transform_5(%arg0: i32) -> (i32, i32) {
    %c0_i32 = arith.constant 0 : i32
    %c0_i32_0 = arith.constant 0 : i32
    %c0_i32_1 = arith.constant 0 : i32
    return %c0_i32, %c0_i32_0 : i32, i32
  }
  func.func @transform_6(%arg0: i32) -> (i32, i32) {
    %c0_i32 = arith.constant 0 : i32
    %c0_i32_0 = arith.constant 0 : i32
    %c0_i32_1 = arith.constant 0 : i32
    return %c0_i32, %c0_i32_0 : i32, i32
  }
  func.func @transform_7(%arg0: i32) -> (i32, i32) {
    %c0_i32 = arith.constant 0 : i32
    %c0_i32_0 = arith.constant 0 : i32
    %c0_i32_1 = arith.constant 0 : i32
    return %c0_i32, %c0_i32_0 : i32, i32
  }
  func.func @transform_8(%arg0: i32) -> (i32, i32) {
    %c0_i32 = arith.constant 0 : i32
    %c0_i32_0 = arith.constant 0 : i32
    %c0_i32_1 = arith.constant 0 : i32
    return %c0_i32, %c0_i32_0 : i32, i32
  }
  func.func @transform_9(%arg0: i32) -> (i32, i32) {
    %c0_i32 = arith.constant 0 : i32
    %c0_i32_0 = arith.constant 0 : i32
    %c0_i32_1 = arith.constant 0 : i32
    return %c0_i32, %c0_i32_0 : i32, i32
  }
  func.func @transform_10(%arg0: i32) -> (i32, i32) {
    %c0_i32 = arith.constant 0 : i32
    %c0_i32_0 = arith.constant 0 : i32
    %c0_i32_1 = arith.constant 0 : i32
    return %c0_i32, %c0_i32_0 : i32, i32
  }
  func.func @transform_11(%arg0: i32) -> (i32, i32) {
    %c0_i32 = arith.constant 0 : i32
    %c0_i32_0 = arith.constant 0 : i32
    %c0_i32_1 = arith.constant 0 : i32
    return %c0_i32, %c0_i32_0 : i32, i32
  }
  func.func @transform_12(%arg0: i32) -> (i32, i32) {
    %c0_i32 = arith.constant 0 : i32
    %c0_i32_0 = arith.constant 0 : i32
    %c0_i32_1 = arith.constant 0 : i32
    return %c0_i32, %c0_i32_0 : i32, i32
  }
  func.func @transform_13(%arg0: i32) -> (i32, i32) {
    %c0_i32 = arith.constant 0 : i32
    %c0_i32_0 = arith.constant 0 : i32
    %c0_i32_1 = arith.constant 0 : i32
    return %c0_i32, %c0_i32_0 : i32, i32
  }
  func.func @transform_14(%arg0: i32) -> (i32, i32, i32) {
    %c0_i32 = arith.constant 0 : i32
    %c0_i32_0 = arith.constant 0 : i32
    %c0_i32_1 = arith.constant 0 : i32
    %c0_i32_2 = arith.constant 0 : i32
    return %c0_i32, %c0_i32_0, %c0_i32_1 : i32, i32, i32
  }
  func.func @transform_15(%arg0: i32) -> (i32, i32, i32, i32) {
    %c0_i32 = arith.constant 0 : i32
    %c0_i32_0 = arith.constant 0 : i32
    %c0_i32_1 = arith.constant 0 : i32
    %c0_i32_2 = arith.constant 0 : i32
    %c0_i32_3 = arith.constant 0 : i32
    return %c0_i32, %c0_i32_0, %c0_i32_1, %c0_i32_2 : i32, i32, i32, i32
  }
}

</mosaic_0001>

<bundles_post_ra>
// kernel: tpu_custom_call.1
= control target key start
LH: loop header
LB: loop body
LE: loop exit
PB: predicated region body
PF: predicated region fallthrough
CT: control target
= control target key end

     0   :  { %21 = vsyncpa [#allocation3], 0  ;;  %v3517_v3 = vmov 0.0|0.0   ;;  %vm3518_vm0 = vmmov 0   ;;  %v3519_v11 = vmov 0.0   ;;  %s4060_s0 = inlined_call_operand.vmem [shape: f32[2,8,32], index: 0, kind: input, shape index: {}]   ;;  %s4061_s1 = inlined_call_operand.vmem [shape: s32[2,1,8], index: 1, kind: input, shape index: {}]   ;;  %s4062_s2 = inlined_call_operand.vmem [shape: f32[4,32,24], index: 2, kind: input, shape index: {}]   ;;  %s4063_s3 = inlined_call_operand.vmem [shape: f32[4,1,24], index: 3, kind: input, shape index: {}]   ;;  %s4064_s4 = inlined_call_operand.vmem [shape: f32[4,8,32], index: 4, kind: input, shape index: {}]   ;;  %s4065_s5 = inlined_call_operand.vmem [shape: f32[1,32], index: 5, kind: input, shape index: {}]   ;;  %s4066_s6 = inlined_call_operand.vmem [shape: f32[1,32], index: 6, kind: input, shape index: {}]   ;;  %s4067_s7 = inlined_call_operand.vmem [shape: f32[1,32], index: 7, kind: input, shape index: {}]   ;;  %s4068_s8 = inlined_call_operand.vmem [shape: f32[32,64], index: 8, kind: input, shape index: {}]   ;;  %s4069_s9 = inlined_call_operand.vmem [shape: f32[1,64], index: 9, kind: input, shape index: {}]   ;;  %s4070_s10 = inlined_call_operand.vmem [shape: f32[64,32], index: 10, kind: input, shape index: {}]   ;;  %s4071_s11 = inlined_call_operand.vmem [shape: f32[1,32], index: 11, kind: input, shape index: {}]   ;;  %s4072_s12 = inlined_call_operand.vmem [shape: f32[1,32], index: 12, kind: input, shape index: {}]   ;;  %s4073_s13 = inlined_call_operand.vmem [shape: f32[1,32], index: 13, kind: input, shape index: {}]   ;;  %s4074_s14 = inlined_call_operand.hbm [shape: f32[2,8,32], index: 14, kind: output, shape index: {0}]   ;;  %s4075_s15 = inlined_call_operand.hbm [shape: f32[2,4,8,8], index: 15, kind: output, shape index: {1}]  }
   0x1   :  { %v53_v0 = vld [vmem:[%s4062_s2] sm:$0xff]  ;;  %v54_v1 = vld [vmem:[%s4062_s2 + $0x8] sm:$0xff]  ;;  %3347 = vmatprep.subr.bf16.mxu0 %v3517_v3  ;;  %3353 = vmatprep.subr.bf16.mxu1 %v3517_v3  ;;  %v55_v6 = vld [vmem:[%s4062_s2 + $0x10] sm:$0xff] }
   0x2   :  { %v57_v2 = vld [vmem:[%s4062_s2 + $0x20] sm:$0xff]  ;;  %v3348_v4 = vpack.c.bf16 %v54_v1, %v53_v0  ;;  %v58_v5 = vld [vmem:[%s4062_s2 + $0x28] sm:$0xff]  ;;  %v56_v7 = vld [vmem:[%s4062_s2 + $0x18] sm:$0xff]  ;;  %3117 = vmatprep.mubr.msk.f32.mxu0 %vm3518_vm0, %v3519_v11  ;;  %3128 = vmatprep.mubr.msk.f32.mxu1 %vm3518_vm0, %v3519_v11 }
   0x3   :  { %v3354_v8 = vpack.c.bf16 %v58_v5, %v57_v2  ;;  %v59_v9 = vld [vmem:[%s4062_s2 + $0x30] sm:$0xff]  ;;  %v60_v10 = vld [vmem:[%s4062_s2 + $0x38] sm:$0xff]  ;;  %v3351_v12 = vpack.c.bf16 %v56_v7, %v55_v6  ;;  %v61_v14 = vld [vmem:[%s4062_s2 + $0x40] sm:$0xff] }
   0x4   :  { %3349 = vmatpush3.bf16.msra.mxu0 %v3348_v4  ;;  %v3357_v13 = vpack.c.bf16 %v60_v10, %v59_v9  ;;  %v62_v15 = vld [vmem:[%s4062_s2 + $0x48] sm:$0xff]  ;;  %v65_v16 = vld [vmem:[%s4062_s2 + $0x60] sm:$0xff] }
   0x5   :  { %3355 = vmatpush3.bf16.msra.mxu1 %v3354_v8  ;;  %3350 = vmatprep.subr.bf16.mxu0 %v3517_v3  ;;  %v66_v17 = vld [vmem:[%s4062_s2 + $0x68] sm:$0xff] }
   0x6   :  { %3356 = vmatprep.subr.bf16.mxu1 %v3517_v3 }
   0x7   :  { %22 = vsyncpa [#allocation5], 0  ;;  %v3654_v18 = vld [vmem:[%s4060_s0] sm:$0xff]  ;;  %vm97_vm1 = vcmask 261120   ;;  %v3360_v19 = vpack.c.bf16 %v62_v15, %v61_v14  ;;  %v3366_v20 = vpack.c.bf16 %v66_v17, %v65_v16  ;;  %v63_v21 = vld [vmem:[%s4062_s2 + $0x50] sm:$0xff]  ;;  %s3520_s26 = smov 120   ;;  %v1299_v0 = vlaneseq }
   0x8   :  { %3352 = vmatpush3.bf16.msra.mxu0 %v3351_v12  ;;  %v64_v22 = vld [vmem:[%s4062_s2 + $0x58] sm:$0xff]  ;;  %v67_v23 = vld [vmem:[%s4062_s2 + $0x70] sm:$0xff]  ;;  %v3695_v27 = vld [vmem:[%s4060_s0 + $0x8] sm:$0xff]  ;;  %vm667_vm2 = vcmask 64512   ;;  %vm2788_vm7 = vcmask 523264  }
   0x9   :  { %3358 = vmatpush3.bf16.msra.mxu1 %v3357_v13  ;;  %3359 = vmatprep.subr.bf16.mxu0 %v3517_v3  ;;  %v68_v24 = vld [vmem:[%s4062_s2 + $0x78] sm:$0xff]  ;;  %v3363_v25 = vpack.c.bf16 %v64_v22, %v63_v21  ;;  %v2950_v28 = vld [vmem:[%s4063_s3] ss:$0 sm:$0xff]  ;;  %v2951_v30 = vld [vmem:[%s4063_s3 + $0x1] ss:$0 sm:$0xff]  ;;  %v1300_v2 = vshrl.u32 %v1299_v0, 7 }
   0xa   :  { %3365 = vmatprep.subr.bf16.mxu1 %v3517_v3  ;;  %v3369_v26 = vpack.c.bf16 %v68_v24, %v67_v23  ;;  %v2952_v36 = vld [vmem:[%s4063_s3 + $0x2] ss:$0 sm:$0xff]  ;;  %v2953_v38 = vld [vmem:[%s4063_s3 + $0x3] ss:$0 sm:$0xff]  ;;  %v1289_v1 = vld [vmem:[%s4061_s1] sm:$0x1] }
   0xb   :  { %3118 = vmatmul.mubr.msk.f32.vlgmr.msra.gmra.mrb[0].mxu0 %vm97_vm1, %v3654_v18  ;;  %vm1291_vm3 = vcmp.ne.s32.totalorder %v1289_v1, 0 }
   0xc   :  { %3129 = vmatmul.mubr.msk.f32.vlgmr.msra.gmra.mrb[0].mxu1 %vm97_vm1, %v3654_v18  ;;  %3361 = vmatpush3.bf16.msra.mxu0 %v3360_v19 }
   0xd   :  { %3367 = vmatpush3.bf16.msra.mxu1 %v3366_v20  ;;  %3362 = vmatprep.subr.bf16.mxu0 %v3517_v3 }
   0xe   :  { %3368 = vmatprep.subr.bf16.mxu1 %v3517_v3  ;;  %3139 = vmatprep.mubr.msk.f32.mxu0 %vm3518_vm0, %v3519_v11 }
   0xf   :  { %3150 = vmatprep.mubr.msk.f32.mxu1 %vm3518_vm0, %v3519_v11 }
  0x10   :  { %3364 = vmatpush3.bf16.msra.mxu0 %v3363_v25 }
  0x11   :  { %3370 = vmatpush3.bf16.msra.mxu1 %v3369_v26  ;;  %3371 = vmatprep.subr.bf16.mxu0 %v3517_v3 }
  0x12   :  { %3377 = vmatprep.subr.bf16.mxu1 %v3517_v3 }
  0x13   :  { %3140 = vmatmul.mubr.msk.f32.vlgmr.msra.gmra.mrb[2].mxu0 %vm97_vm1, %v3654_v18 }
  0x14   :  { %3151 = vmatmul.mubr.msk.f32.vlgmr.msra.gmra.mrb[2].mxu1 %vm97_vm1, %v3654_v18  ;;  %3373 = vmatpush3.bf16.msra.mxu0 %v3348_v4  ;;  %v3521_v4 = vmov 0  }
  0x15   :  { %3379 = vmatpush3.bf16.msra.mxu1 %v3354_v8  ;;  %3374 = vmatprep.subr.bf16.mxu0 %v3517_v3  ;;  %v1297_v5 = vsel %vm1291_vm3, 1, %v3521_v4 }
  0x16   :  { %3380 = vmatprep.subr.bf16.mxu1 %v3517_v3  ;;  %3161 = vmatprep.mubr.msk.f32.mxu0 %vm3518_vm0, %v3519_v11 }
  0x17   :  { %3172 = vmatprep.mubr.msk.f32.mxu1 %vm3518_vm0, %v3519_v11 }
  0x18   :  { %3376 = vmatpush3.bf16.msra.mxu0 %v3351_v12  ;;  %v1290_v12 = vld [vmem:[%s4061_s1 + $0x1] sm:$0x1]  ;;  %s3522_s1 = smov 112  }
  0x19   :  { %3382 = vmatpush3.bf16.msra.mxu1 %v3357_v13  ;;  %3383 = vmatprep.subr.bf16.mxu0 %v3517_v3  ;;  %vm1292_vm5 = vcmp.ne.s32.totalorder %v1290_v12, 0 }
  0x1a   :  { %3389 = vmatprep.subr.bf16.mxu1 %v3517_v3  ;;  %v1298_v23 = vsel %vm1292_vm5, 1, %v3521_v4 }
  0x1b   :  { %3162 = vmatmul.mubr.msk.f32.vlgmr.msra.gmra.mrb[4].mxu0 %vm97_vm1, %v3695_v27 }
  0x1c   :  { %3173 = vmatmul.mubr.msk.f32.vlgmr.msra.gmra.mrb[4].mxu1 %vm97_vm1, %v3695_v27  ;;  %3385 = vmatpush3.bf16.msra.mxu0 %v3360_v19 }
  0x1d   :  { %3391 = vmatpush3.bf16.msra.mxu1 %v3366_v20  ;;  %3386 = vmatprep.subr.bf16.mxu0 %v3517_v3 }
  0x1e   :  { %3392 = vmatprep.subr.bf16.mxu1 %v3517_v3  ;;  %3183 = vmatprep.mubr.msk.f32.mxu0 %vm3518_vm0, %v3519_v11  ;;  %v1301_v3 = vsub.s32 0, %v1300_v2 }
  0x1f   :  { %3194 = vmatprep.mubr.msk.f32.mxu1 %vm3518_vm0, %v3519_v11 }
  0x20   :  { %3388 = vmatpush3.bf16.msra.mxu0 %v3363_v25  ;;  %v1302_v6 = vrot.slane %v1297_v5, %v1301_v3 }
  0x21   :  { %3394 = vmatpush3.bf16.msra.mxu1 %v3369_v26  ;;  %3197 = vmatprep.subr.mxu0 %v3519_v11 }
  0x22   :  { %3212 = vmatprep.subr.mxu1 %v3519_v11  ;;  %vm1307_vm4 = vcmp.eq.s32.totalorder %v1302_v6, 1 }
  0x23   :  { %3184 = vmatmul.mubr.msk.f32.vlgmr.msra.gmra.mrb[6].mxu0 %vm97_vm1, %v3695_v27 }
  0x24   :  { %3195 = vmatmul.mubr.msk.f32.vlgmr.msra.gmra.mrb[6].mxu1 %vm97_vm1, %v3695_v27  ;;  %3199 = vmatprep.mubr.msk.f32.mxu0 %vm3518_vm0, %v3519_v11 }
  0x25   :  { %3214 = vmatprep.mubr.msk.f32.mxu1 %vm3518_vm0, %v3519_v11 }
  0xde   :  { %v167_v29 = vpop.f32.mrb[0].mxu0 }
  0xdf   :  { %v3725_v31 = vadd.f32 %v2950_v28, %v167_v29  ;;  %v3119_v32 = vpop.f32.mrb[1].mxu0  ;;  %v237_v33 = vpop.f32.mrb[0].mxu1 }
  0xe0   :  { %v3130_v34 = vpop.f32.mrb[1].mxu1  ;;  %v3727_v35 = vadd.f32 %v2951_v30, %v237_v33 }
  0xe1   :  { %665 = vrot.lane.b32.xlu0 %v3725_v31, %s3520_s26 }
  0xe5   :  { %743 = vrot.lane.b32.xlu0 %v3727_v35, %s3520_s26 }
  0xe6   :  { %v307_v37 = vpop.f32.mrb[2].mxu0 }
  0xe7   :  { %v3737_v39 = vadd.f32 %v2952_v36, %v307_v37  ;;  %v3141_v40 = vpop.f32.mrb[3].mxu0  ;;  %v377_v41 = vpop.f32.mrb[2].mxu1 }
  0xe8   :  { %v3152_v42 = vpop.f32.mrb[3].mxu1  ;;  %v3739_v43 = vadd.f32 %v2953_v38, %v377_v41 }
  0xe9   :  { %820 = vrot.lane.b32.xlu1 %v3737_v39, %s3520_s26 }
  0xed   :  { %897 = vrot.lane.b32.xlu1 %v3739_v43, %s3520_s26 }
  0xee   :  { %v450_v44 = vpop.f32.mrb[4].mxu0 }
  0xef   :  { %v3743_v45 = vadd.f32 %v2950_v28, %v450_v44  ;;  %v520_v46 = vpop.f32.mrb[4].mxu1  ;;  %v3163_v47 = vpop.f32.mrb[5].mxu0  ;;  %v1306_v28 = vrot.slane %v1298_v23, %v1301_v3 }
  0xf0   :  { %v3745_v48 = vadd.f32 %v2951_v30, %v520_v46  ;;  %v3174_v49 = vpop.f32.mrb[5].mxu1 }
  0xf1   :  { %974 = vrot.lane.b32.xlu0 %v3743_v45, %s3520_s26  ;;  %vm1308_vm6 = vcmp.eq.s32.totalorder %v1306_v28, 1 }
  0xf2   :  { %1051 = vrot.lane.b32.xlu1 %v3745_v48, %s3520_s26 }
  0xf6   :  { %v590_v50 = vpop.f32.mrb[6].mxu0 }
  0xf7   :  { %v3749_v51 = vadd.f32 %v2952_v36, %v590_v50  ;;  %v660_v52 = vpop.f32.mrb[6].mxu1  ;;  %v3185_v53 = vpop.f32.mrb[7].mxu0 }
  0xf8   :  { %v3751_v54 = vadd.f32 %v2953_v38, %v660_v52  ;;  %v3196_v55 = vpop.f32.mrb[7].mxu1 }
  0xf9   :  { %1128 = vrot.lane.b32.xlu0 %v3749_v51, %s3520_s26 }
  0xfa   :  { %1205 = vrot.lane.b32.xlu1 %v3751_v54, %s3520_s26 }
 0x153   :  { %v666_v56 = vpop.permute.xlu0 %665 }
 0x154   :  { %3198 = vmatpush3.xpose.msk.msra.mxu0 %vm667_vm2, %v666_v56 }
 0x155   :  { %3202 = vmatprep.subr.mxu0 %v3519_v11 }
 0x157   :  { %3200 = vmatmul.mubr.msk.f32.vlgmr.msra.gmra.mrb[8].mxu0 %vm667_vm2, %v3725_v31  ;;  %v744_v57 = vpop.permute.xlu0 %743 }
 0x158   :  { %3203 = vmatpush3.xpose.msk.msra.mxu0 %vm667_vm2, %v744_v57  ;;  %3204 = vmatprep.mubr.msk.f32.mxu0 %vm3518_vm0, %v3519_v11 }
 0x159   :  { %3207 = vmatprep.subr.mxu0 %v3519_v11 }
 0x15b   :  { %3205 = vmatmul.mubr.msk.f32.vlgmr.msra.gmra.mrb[10].mxu0 %vm667_vm2, %v3727_v35  ;;  %v821_v58 = vpop.permute.xlu1 %820 }
 0x15c   :  { %3208 = vmatpush3.xpose.msk.msra.mxu0 %vm667_vm2, %v821_v58  ;;  %3209 = vmatprep.mubr.msk.f32.mxu0 %vm3518_vm0, %v3519_v11 }
 0x15d   :  { %3217 = vmatprep.subr.mxu0 %v3519_v11 }
 0x15f   :  { %3210 = vmatmul.mubr.msk.f32.vlgmr.msra.gmra.mrb[12].mxu0 %vm667_vm2, %v3737_v39  ;;  %v898_v59 = vpop.permute.xlu1 %897 }
 0x160   :  { %3213 = vmatpush3.xpose.msk.msra.mxu1 %vm667_vm2, %v898_v59  ;;  %3219 = vmatprep.mubr.msk.f32.mxu0 %vm3518_vm0, %v3519_v11 }
 0x161   :  { %3222 = vmatprep.subr.mxu1 %v3519_v11 }
 0x163   :  { %3215 = vmatmul.mubr.msk.f32.vlgmr.msra.gmra.mrb[8].mxu1 %vm667_vm2, %v3739_v43  ;;  %v975_v60 = vpop.permute.xlu0 %974 }
 0x164   :  { %v1052_v61 = vpop.permute.xlu1 %1051  ;;  %3218 = vmatpush3.xpose.msk.msra.mxu0 %vm667_vm2, %v975_v60  ;;  %3224 = vmatprep.mubr.msk.f32.mxu1 %vm3518_vm0, %v3519_v11 }
 0x165   :  { %3223 = vmatpush3.xpose.msk.msra.mxu1 %vm667_vm2, %v1052_v61  ;;  %3227 = vmatprep.subr.mxu0 %v3519_v11 }
 0x166   :  { %3232 = vmatprep.subr.mxu1 %v3519_v11 }
 0x167   :  { %3220 = vmatmul.mubr.msk.f32.vlgmr.msra.gmra.mrb[14].mxu0 %vm667_vm2, %v3743_v45 }
 0x168   :  { %3225 = vmatmul.mubr.msk.f32.vlgmr.msra.gmra.mrb[10].mxu1 %vm667_vm2, %v3745_v48  ;;  %3229 = vmatprep.mubr.msk.f32.mxu0 %vm3518_vm0, %v3519_v11 }
 0x169   :  { %3234 = vmatprep.mubr.msk.f32.mxu1 %vm3518_vm0, %v3519_v11 }
 0x16b   :  { %v1129_v62 = vpop.permute.xlu0 %1128 }
 0x16c   :  { %v1206_v63 = vpop.permute.xlu1 %1205  ;;  %3228 = vmatpush3.xpose.msk.msra.mxu0 %vm667_vm2, %v1129_v62 }
 0x16d   :  { %3233 = vmatpush3.xpose.msk.msra.mxu1 %vm667_vm2, %v1206_v63  ;;  %3237 = vmatprep.subr.mxu0 %v3519_v11 }
 0x16e   :  { %3242 = vmatprep.subr.mxu1 %v3519_v11 }
 0x16f   :  { %3230 = vmatmul.mubr.msk.f32.vlgmr.msra.gmra.mrb[16].mxu0 %vm667_vm2, %v3749_v51 }
 0x170   :  { %3235 = vmatmul.mubr.msk.f32.vlgmr.msra.gmra.mrb[12].mxu1 %vm667_vm2, %v3751_v54  ;;  %3239 = vmatprep.mubr.msk.f32.mxu0 %vm3518_vm0, %v3519_v11 }
 0x171   :  { %3244 = vmatprep.mubr.msk.f32.mxu1 %vm3518_vm0, %v3519_v11 }
 0x22a   :  { %v738_v7 = vpop.f32.mrb[8].mxu0 }
 0x22b   :  { %v1281_v8 = vmul.f32 0.35355338, %v738_v7  ;;  %v3201_v9 = vpop.f32.mrb[9].mxu0 }
 0x22d   :  { %v1309_v10 = vsel %vm1307_vm4, -10000.0, %v1281_v8 }
 0x22e   :  { %v815_v13 = vpop.f32.mrb[10].mxu0  ;;  %v1317_v14 = vsel %vm667_vm2, %v1309_v10, -inf }
 0x22f   :  { %v1282_v15 = vmul.f32 0.35355338, %v815_v13  ;;  %1318 = vmax.xlane.f32.xlu0 %v1317_v14  ;;  %v3206_v16 = vpop.f32.mrb[11].mxu0 }
 0x231   :  { %v1310_v17 = vsel %vm1307_vm4, -10000.0, %v1282_v15 }
 0x232   :  { %v892_v19 = vpop.f32.mrb[12].mxu0  ;;  %v1320_v20 = vsel %vm667_vm2, %v1310_v17, -inf }
 0x233   :  { %v1283_v21 = vmul.f32 0.35355338, %v892_v19  ;;  %1321 = vmax.xlane.f32.xlu1 %v1320_v20  ;;  %v3211_v22 = vpop.f32.mrb[13].mxu0 }
 0x235   :  { %v1311_v24 = vsel %vm1307_vm4, -10000.0, %v1283_v21 }
 0x236   :  { %v969_v25 = vpop.f32.mrb[8].mxu1  ;;  %v1323_v26 = vsel %vm667_vm2, %v1311_v24, -inf }
 0x237   :  { %v1284_v29 = vmul.f32 0.35355338, %v969_v25  ;;  %v3216_v30 = vpop.f32.mrb[9].mxu1  ;;  %1324 = vmax.xlane.f32.xlu0 %v1323_v26 }
 0x239   :  { %v1312_v32 = vsel %vm1307_vm4, -10000.0, %v1284_v29 }
 0x23a   :  { %v1046_v33 = vpop.f32.mrb[14].mxu0  ;;  %v1326_v34 = vsel %vm667_vm2, %v1312_v32, -inf }
 0x23b   :  { %v1285_v36 = vmul.f32 0.35355338, %v1046_v33  ;;  %v1123_v37 = vpop.f32.mrb[10].mxu1  ;;  %1327 = vmax.xlane.f32.xlu0 %v1326_v34  ;;  %v3221_v38 = vpop.f32.mrb[15].mxu0 }
 0x23c   :  { %v1286_v40 = vmul.f32 0.35355338, %v1123_v37  ;;  %v3226_v41 = vpop.f32.mrb[11].mxu1 }
 0x23d   :  { %v1313_v42 = vsel %vm1308_vm6, -10000.0, %v1285_v36 }
 0x23e   :  { %v1314_v44 = vsel %vm1308_vm6, -10000.0, %v1286_v40  ;;  %v1329_v46 = vsel %vm667_vm2, %v1313_v42, -inf }
 0x23f   :  { %v1332_v47 = vsel %vm667_vm2, %v1314_v44, -inf  ;;  %1330 = vmax.xlane.f32.xlu1 %v1329_v46 }
 0x240   :  { %1333 = vmax.xlane.f32.xlu0 %v1332_v47 }
 0x242   :  { %v1200_v49 = vpop.f32.mrb[16].mxu0 }
 0x243   :  { %v1287_v50 = vmul.f32 0.35355338, %v1200_v49  ;;  %v1277_v52 = vpop.f32.mrb[12].mxu1  ;;  %v3231_v53 = vpop.f32.mrb[17].mxu0 }
 0x244   :  { %v1288_v55 = vmul.f32 0.35355338, %v1277_v52  ;;  %v3236_v56 = vpop.f32.mrb[13].mxu1 }
 0x245   :  { %v1315_v57 = vsel %vm1308_vm6, -10000.0, %v1287_v50 }
 0x246   :  { %v1316_v58 = vsel %vm1308_vm6, -10000.0, %v1288_v55  ;;  %v1335_v59 = vsel %vm667_vm2, %v1315_v57, -inf }
 0x247   :  { %v1338_v60 = vsel %vm667_vm2, %v1316_v58, -inf  ;;  %1336 = vmax.xlane.f32.xlu1 %v1335_v59 }
 0x248   :  { %1339 = vmax.xlane.f32.xlu0 %v1338_v60 }
 0x258   :  { %1413 = vrot.lane.b32.xlu1 %v3725_v31, %s3522_s1 }
 0x25c   :  { %1565 = vrot.lane.b32.xlu1 %v3737_v39, %s3522_s1 }
 0x25e   :  { %1489 = vrot.lane.b32.xlu0 %v3727_v35, %s3522_s1 }
 0x260   :  { %1641 = vrot.lane.b32.xlu1 %v3739_v43, %s3522_s1 }
 0x262   :  { %1717 = vrot.lane.b32.xlu0 %v3743_v45, %s3522_s1 }
 0x264   :  { %1793 = vrot.lane.b32.xlu1 %v3745_v48, %s3522_s1 }
 0x2bc   :  { %v1319_v61 = vpop.xlane.xlu0 %1318 }
 0x2bd   :  { %v1341_v62 = vsub.f32 %v1309_v10, %v1319_v61 }
 0x2bf   :  { %v1349_v63 = vmul.f32 1.442695, %v1341_v62 }
 0x2c0   :  { %v1322_v0 = vpop.xlane.xlu1 %1321 }
 0x2c1   :  { %3429 = vpow2.f32 %v1349_v63  ;;  %v1342_v31 = vsub.f32 %v1310_v17, %v1322_v0 }
 0x2c3   :  { %v1351_v1 = vmul.f32 1.442695, %v1342_v31 }
 0x2c4   :  { %v1325_v39 = vpop.xlane.xlu0 %1324 }
 0x2c5   :  { %3431 = vpow2.f32 %v1351_v1  ;;  %v1343_v2 = vsub.f32 %v1311_v24, %v1325_v39 }
 0x2c7   :  { %v1353_v35 = vmul.f32 1.442695, %v1343_v2 }
 0x2c8   :  { %v1328_v3 = vpop.xlane.xlu0 %1327 }
 0x2c9   :  { %3433 = vpow2.f32 %v1353_v35  ;;  %v1344_v43 = vsub.f32 %v1312_v32, %v1328_v3 }
 0x2cb   :  { %v3430_v4 = vpop.eup %3429  ;;  %v1355_v5 = vmul.f32 1.442695, %v1344_v43 }
 0x2cc   :  { %v1331_v45 = vpop.xlane.xlu1 %1330  ;;  %v1365_v6 = vsel %vm667_vm2, %v3430_v4, 0.0 }
 0x2cd   :  { %3435 = vpow2.f32 %v1355_v5  ;;  %v1334_v48 = vpop.xlane.xlu0 %1333  ;;  %v1345_v7 = vsub.f32 %v1313_v42, %v1331_v45  ;;  %1366 = vadd.xlane.f32.xlu1 %v1365_v6  ;;  %v2022_v5 = vld [vmem:[%s4064_s4 + $0x8] sm:$0xff]  ;;  %v2023_v45 = vld [vmem:[%s4064_s4 + $0x10] sm:$0xff] }
 0x2ce   :  { %v1346_v8 = vsub.f32 %v1314_v44, %v1334_v48 }
 0x2cf   :  { %v3432_v9 = vpop.eup %3431  ;;  %v1357_v10 = vmul.f32 1.442695, %v1345_v7  ;;  %v2024_v7 = vld [vmem:[%s4064_s4 + $0x18] sm:$0xff] }
 0x2d0   :  { %v1359_v12 = vmul.f32 1.442695, %v1346_v8  ;;  %v1368_v13 = vsel %vm667_vm2, %v3432_v9, 0.0 }
 0x2d1   :  { %3437 = vpow2.f32 %v1357_v10  ;;  %1369 = vadd.xlane.f32.xlu0 %v1368_v13 }
 0x2d2   :  { %3439 = vpow2.f32 %v1359_v12 }
 0x2d3   :  { %v3839_v14 = vpop.eup %3433 }
 0x2d4   :  { %v1337_v15 = vpop.xlane.xlu1 %1336  ;;  %v1371_v16 = vsel %vm667_vm2, %v3839_v14, 0.0 }
 0x2d5   :  { %v1340_v17 = vpop.xlane.xlu0 %1339  ;;  %v1347_v19 = vsub.f32 %v1315_v57, %v1337_v15  ;;  %1372 = vadd.xlane.f32.xlu1 %v1371_v16 }
 0x2d6   :  { %v1348_v20 = vsub.f32 %v1316_v58, %v1340_v17 }
 0x2d7   :  { %v3843_v21 = vpop.eup %3435  ;;  %v1361_v22 = vmul.f32 1.442695, %v1347_v19 }
 0x2d8   :  { %v1363_v23 = vmul.f32 1.442695, %v1348_v20  ;;  %v1414_v24 = vpop.permute.xlu1 %1413  ;;  %v1374_v25 = vsel %vm667_vm2, %v3843_v21, 0.0 }
 0x2d9   :  { %3441 = vpow2.f32 %v1361_v22  ;;  %v1490_v26 = vpop.permute.xlu0 %1489  ;;  %1375 = vadd.xlane.f32.xlu0 %v1374_v25  ;;  %3238 = vmatpush3.msra.mxu0 %v1414_v24 }
 0x2da   :  { %3443 = vpow2.f32 %v1363_v23  ;;  %3243 = vmatpush3.msra.mxu1 %v1490_v26  ;;  %3247 = vmatprep.subr.mxu0 %v3519_v11 }
 0x2db   :  { %v3848_v28 = vpop.eup %3437  ;;  %3252 = vmatprep.subr.mxu1 %v3519_v11 }
 0x2dc   :  { %v3851_v29 = vpop.eup %3439  ;;  %v1377_v30 = vsel %vm667_vm2, %v3848_v28, 0.0  ;;  %v1566_v38 = vpop.permute.xlu1 %1565 }
 0x2dd   :  { %v1380_v32 = vsel %vm667_vm2, %v3851_v29, 0.0  ;;  %1378 = vadd.xlane.f32.xlu1 %v1377_v30  ;;  %v1718_v42 = vpop.permute.xlu0 %1717 }
 0x2de   :  { %1381 = vadd.xlane.f32.xlu0 %v1380_v32 }
 0x2e0   :  { %v1642_v40 = vpop.permute.xlu1 %1641 }
 0x2e3   :  { %v3857_v33 = vpop.eup %3441 }
 0x2e4   :  { %v3859_v34 = vpop.eup %3443  ;;  %v1383_v36 = vsel %vm667_vm2, %v3857_v33, 0.0  ;;  %v1794_v41 = vpop.permute.xlu1 %1793 }
 0x2e5   :  { %v1386_v37 = vsel %vm667_vm2, %v3859_v34, 0.0  ;;  %1384 = vadd.xlane.f32.xlu1 %v1383_v36 }
 0x2e6   :  { %1387 = vadd.xlane.f32.xlu0 %v1386_v37 }
 0x2f6   :  { %1945 = vrot.lane.b32.xlu1 %v3751_v54, %s3522_s1 }
 0x2fc   :  { %1869 = vrot.lane.b32.xlu0 %v3749_v51, %s3522_s1 }
 0x35a   :  { %v1367_v44 = vpop.xlane.xlu1 %1366 }
 0x35b   :  { %3445 = vrcp.f32 %v1367_v44 }
 0x35e   :  { %v1370_v46 = vpop.xlane.xlu0 %1369 }
 0x35f   :  { %3447 = vrcp.f32 %v1370_v46 }
 0x362   :  { %v1373_v47 = vpop.xlane.xlu1 %1372 }
 0x363   :  { %3449 = vrcp.f32 %v1373_v47 }
 0x365   :  { %v3446_v49 = vpop.eup %3445 }
 0x366   :  { %v1397_v50 = vmul.f32 %v3446_v49, %v3430_v4  ;;  %v1376_v52 = vpop.xlane.xlu0 %1375  ;;  %v2021_v4 = vld [vmem:[%s4064_s4] sm:$0xff] }
 0x367   :  { %3451 = vrcp.f32 %v1376_v52 }
 0x368   :  { %1405 = vst.msk [vmem:[#allocation4] sm:$0xff] %vm667_vm2, %v1397_v50  ;;  %3240 = vmatmul.mubr.msk.f32.vlgmr.msra.gmra.mrb[18].mxu0 %vm667_vm2, %v1397_v50 }
 0x369   :  { %v3448_v54 = vpop.eup %3447  ;;  %3248 = vmatpush3.msra.mxu0 %v1566_v38  ;;  %3249 = vmatprep.mubr.msk.f32.mxu0 %vm3518_vm0, %v3519_v11 }
 0x36a   :  { %v1398_v51 = vmul.f32 %v3448_v54, %v3432_v9  ;;  %v1379_v53 = vpop.xlane.xlu1 %1378  ;;  %3257 = vmatprep.subr.mxu0 %v3519_v11 }
 0x36b   :  { %v1382_v55 = vpop.xlane.xlu0 %1381  ;;  %3453 = vrcp.f32 %v1379_v53 }
 0x36c   :  { %1406 = vst.msk [vmem:[#allocation4 + $0x8] sm:$0xff] %vm667_vm2, %v1398_v51  ;;  %3455 = vrcp.f32 %v1382_v55  ;;  %3245 = vmatmul.mubr.msk.f32.vlgmr.msra.gmra.mrb[14].mxu1 %vm667_vm2, %v1398_v51 }
 0x36d   :  { %v3450_v56 = vpop.eup %3449  ;;  %3253 = vmatpush3.msra.mxu1 %v1642_v40  ;;  %3254 = vmatprep.mubr.msk.f32.mxu1 %vm3518_vm0, %v3519_v11  ;;  %v2994_v40 = vld [vmem:[%s4065_s5] ss:$0 sm:$0xff] }
 0x36e   :  { %v1399_v57 = vmul.f32 %v3450_v56, %v3839_v14  ;;  %3262 = vmatprep.subr.mxu1 %v3519_v11 }
 0x370   :  { %1407 = vst.msk [vmem:[#allocation4 + $0x10] sm:$0xff] %vm667_vm2, %v1399_v57  ;;  %3250 = vmatmul.mubr.msk.f32.vlgmr.msra.gmra.mrb[20].mxu0 %vm667_vm2, %v1399_v57 }
 0x371   :  { %v3452_v58 = vpop.eup %3451  ;;  %3258 = vmatpush3.msra.mxu0 %v1718_v42  ;;  %3259 = vmatprep.mubr.msk.f32.mxu0 %vm3518_vm0, %v3519_v11 }
 0x372   :  { %v1400_v59 = vmul.f32 %v3452_v58, %v3843_v21  ;;  %v1385_v60 = vpop.xlane.xlu1 %1384  ;;  %3267 = vmatprep.subr.mxu0 %v3519_v11 }
 0x373   :  { %v1388_v61 = vpop.xlane.xlu0 %1387  ;;  %3457 = vrcp.f32 %v1385_v60 }
 0x374   :  { %1408 = vst.msk [vmem:[#allocation4 + $0x18] sm:$0xff] %vm667_vm2, %v1400_v59  ;;  %3459 = vrcp.f32 %v1388_v61  ;;  %3255 = vmatmul.mubr.msk.f32.vlgmr.msra.gmra.mrb[16].mxu1 %vm667_vm2, %v1400_v59 }
 0x375   :  { %v3454_v62 = vpop.eup %3453  ;;  %3263 = vmatpush3.msra.mxu1 %v1794_v41  ;;  %3264 = vmatprep.mubr.msk.f32.mxu1 %vm3518_vm0, %v3519_v11 }
 0x376   :  { %v3456_v63 = vpop.eup %3455  ;;  %v1401_v0 = vmul.f32 %v3454_v62, %v3848_v28  ;;  %3272 = vmatprep.subr.mxu1 %v3519_v11  ;;  %v1946_v39 = vpop.permute.xlu1 %1945 }
 0x377   :  { %v1402_v31 = vmul.f32 %v3456_v63, %v3851_v29  ;;  %v1870_v1 = vpop.permute.xlu0 %1869 }
 0x378   :  { %1409 = vst.msk [vmem:[#allocation4 + $0x20] sm:$0xff] %vm667_vm2, %v1401_v0  ;;  %3260 = vmatmul.mubr.msk.f32.vlgmr.msra.gmra.mrb[22].mxu0 %vm667_vm2, %v1401_v0 }
 0x379   :  { %1410 = vst.msk [vmem:[#allocation4 + $0x28] sm:$0xff] %vm667_vm2, %v1402_v31  ;;  %3265 = vmatmul.mubr.msk.f32.vlgmr.msra.gmra.mrb[18].mxu1 %vm667_vm2, %v1402_v31  ;;  %3268 = vmatpush3.msra.mxu0 %v1870_v1 }
 0x37a   :  { %3273 = vmatpush3.msra.mxu1 %v1946_v39  ;;  %3269 = vmatprep.mubr.msk.f32.mxu0 %vm3518_vm0, %v3519_v11 }
 0x37b   :  { %3274 = vmatprep.mubr.msk.f32.mxu1 %vm3518_vm0, %v3519_v11  ;;  %3277 = vmatprep.subr.mxu0 %v3519_v11 }
 0x37c   :  { %3282 = vmatprep.subr.mxu1 %v3519_v11 }
 0x37d   :  { %v3458_v2 = vpop.eup %3457 }
 0x37e   :  { %v3460_v35 = vpop.eup %3459  ;;  %v1403_v3 = vmul.f32 %v3458_v2, %v3857_v33 }
 0x37f   :  { %v1404_v43 = vmul.f32 %v3460_v35, %v3859_v34 }
 0x380   :  { %1411 = vst.msk [vmem:[#allocation4 + $0x30] sm:$0xff] %vm667_vm2, %v1403_v3  ;;  %3270 = vmatmul.mubr.msk.f32.vlgmr.msra.gmra.mrb[24].mxu0 %vm667_vm2, %v1403_v3 }
 0x381   :  { %1412 = vst.msk [vmem:[#allocation4 + $0x38] sm:$0xff] %vm667_vm2, %v1404_v43  ;;  %3275 = vmatmul.mubr.msk.f32.vlgmr.msra.gmra.mrb[20].mxu1 %vm667_vm2, %v1404_v43  ;;  %3279 = vmatprep.mubr.msk.f32.mxu0 %vm3518_vm0, %v3519_v11 }
 0x382   :  { %3284 = vmatprep.mubr.msk.f32.mxu1 %vm3518_vm0, %v3519_v11  ;;  %3278 = vmatpush3.msra.mxu0 %v2021_v4 }
 0x383   :  { %3287 = vmatprep.subr.mxu0 %v3519_v11  ;;  %3283 = vmatpush3.msra.mxu1 %v2022_v5 }
 0x384   :  { %3292 = vmatprep.subr.mxu1 %v3519_v11 }
 0x43b   :  { %v1485_v6 = vpop.f32.mrb[18].mxu0 }
 0x43c   :  { %v3241_v48 = vpop.f32.mrb[19].mxu0  ;;  %3280 = vmatmul.mubr.msk.f32.vlgmr.msra.gmra.mrb[26].mxu0 %vm667_vm2, %v1485_v6 }
 0x43d   :  { %3288 = vmatpush3.msra.mxu0 %v2023_v45  ;;  %3289 = vmatprep.mubr.msk.f32.mxu0 %vm3518_vm0, %v3519_v11  ;;  %v2680_v48 = vld [vmem:[%s4068_s8 + $0x8] sm:$0xff] }
 0x43e   :  { %3297 = vmatprep.subr.mxu0 %v3519_v11 }
 0x43f   :  { %v1561_v8 = vpop.f32.mrb[14].mxu1 }
 0x440   :  { %v3246_v9 = vpop.f32.mrb[15].mxu1  ;;  %3285 = vmatmul.mubr.msk.f32.vlgmr.msra.gmra.mrb[22].mxu1 %vm667_vm2, %v1561_v8  ;;  %v2681_v8 = vld [vmem:[%s4068_s8 + $0x10] sm:$0xff] }
 0x441   :  { %3293 = vmatpush3.msra.mxu1 %v2024_v7  ;;  %3294 = vmatprep.mubr.msk.f32.mxu1 %vm3518_vm0, %v3519_v11  ;;  %v2682_v9 = vld [vmem:[%s4068_s8 + $0x18] sm:$0xff] }
 0x442   :  { %3302 = vmatprep.subr.mxu1 %v3519_v11 }
 0x443   :  { %v1637_v10 = vpop.f32.mrb[20].mxu0 }
 0x444   :  { %v3251_v12 = vpop.f32.mrb[21].mxu0  ;;  %3290 = vmatmul.mubr.msk.f32.vlgmr.msra.gmra.mrb[28].mxu0 %vm667_vm2, %v1637_v10  ;;  %v3399_v10 = vpack.c.bf16 %v2682_v9, %v2681_v8 }
 0x445   :  { %3298 = vmatpush3.msra.mxu0 %v2021_v4  ;;  %3299 = vmatprep.mubr.msk.f32.mxu0 %vm3518_vm0, %v3519_v11  ;;  %v2773_v12 = vld [vmem:[%s4070_s10] sm:$0xff] }
 0x446   :  { %3307 = vmatprep.subr.mxu0 %v3519_v11 }
 0x447   :  { %v1713_v13 = vpop.f32.mrb[16].mxu1 }
 0x448   :  { %v3256_v14 = vpop.f32.mrb[17].mxu1  ;;  %3295 = vmatmul.mubr.msk.f32.vlgmr.msra.gmra.mrb[24].mxu1 %vm667_vm2, %v1713_v13  ;;  %v2774_v13 = vld [vmem:[%s4070_s10 + $0x8] sm:$0xff] }
 0x449   :  { %3303 = vmatpush3.msra.mxu1 %v2022_v5  ;;  %3304 = vmatprep.mubr.msk.f32.mxu1 %vm3518_vm0, %v3519_v11  ;;  %v2775_v14 = vld [vmem:[%s4070_s10 + $0x10] sm:$0xff] }
 0x44a   :  { %3312 = vmatprep.subr.mxu1 %v3519_v11 }
 0x44b   :  { %v1789_v15 = vpop.f32.mrb[22].mxu0 }
 0x44c   :  { %v1865_v16 = vpop.f32.mrb[18].mxu1  ;;  %v3261_v17 = vpop.f32.mrb[23].mxu0  ;;  %3300 = vmatmul.mubr.msk.f32.vlgmr.msra.gmra.mrb[30].mxu0 %vm667_vm2, %v1789_v15  ;;  %v3403_v15 = vpack.c.bf16 %v2774_v13, %v2773_v12 }
 0x44d   :  { %v3266_v19 = vpop.f32.mrb[19].mxu1  ;;  %3305 = vmatmul.mubr.msk.f32.vlgmr.msra.gmra.mrb[26].mxu1 %vm667_vm2, %v1865_v16  ;;  %3308 = vmatpush3.msra.mxu0 %v2023_v45  ;;  %v2776_v16 = vld [vmem:[%s4070_s10 + $0x18] sm:$0xff] }
 0x44e   :  { %3309 = vmatprep.mubr.msk.f32.mxu0 %vm3518_vm0, %v3519_v11  ;;  %3313 = vmatpush3.msra.mxu1 %v2024_v7  ;;  %v3407_v17 = vpack.c.bf16 %v2776_v16, %v2775_v14  ;;  %v2777_v19 = vld [vmem:[%s4070_s10 + $0x20] sm:$0xff] }
 0x44f   :  { %3314 = vmatprep.mubr.msk.f32.mxu1 %vm3518_vm0, %v3519_v11  ;;  %3404 = vmatprep.subr.bf16.mxu1 %v3403_v15 }
 0x453   :  { %v1941_v20 = vpop.f32.mrb[24].mxu0 }
 0x454   :  { %v2017_v21 = vpop.f32.mrb[20].mxu1  ;;  %v3271_v22 = vpop.f32.mrb[25].mxu0  ;;  %3310 = vmatmul.mubr.msk.f32.vlgmr.msra.gmra.mrb[32].mxu0 %vm667_vm2, %v1941_v20  ;;  %v2778_v20 = vld [vmem:[%s4070_s10 + $0x28] sm:$0xff] }
 0x455   :  { %v3276_v23 = vpop.f32.mrb[21].mxu1  ;;  %3315 = vmatmul.mubr.msk.f32.vlgmr.msra.gmra.mrb[28].mxu1 %vm667_vm2, %v2017_v21  ;;  %v3411_v21 = vpack.c.bf16 %v2778_v20, %v2777_v19 }
 0x456   :  { %3406 = vmatpush3.bf16.msra.mxu1 %v3403_v15 }
 0x457   :  { %3408 = vmatprep.subr.bf16.mxu1 %v3407_v17 }
 0x45a   :  { %3410 = vmatpush3.bf16.msra.mxu1 %v3407_v17 }
 0x45b   :  { %3412 = vmatprep.subr.bf16.mxu1 %v3411_v21 }
 0x45e   :  { %3414 = vmatpush3.bf16.msra.mxu1 %v3411_v21 }
 0x50f   :  { %v2094_v24 = vpop.f32.mrb[26].mxu0 }
 0x510   :  { %v3281_v25 = vpop.f32.mrb[27].mxu0  ;;  %v2609_v28 = vsel %vm97_vm1, %v2094_v24, 0.0 }
 0x513   :  { %v2167_v26 = vpop.f32.mrb[22].mxu1 }
 0x514   :  { %v2610_v29 = vsel %vm97_vm1, %v2167_v26, 0.0  ;;  %v3286_v30 = vpop.f32.mrb[23].mxu1 }
 0x515   :  { %v2611_v32 = vadd.f32 %v2610_v29, %v2609_v28  ;;  %v2995_v29 = vld [vmem:[%s4066_s6] ss:$0 sm:$0xff] }
 0x517   :  { %v2240_v33 = vpop.f32.mrb[28].mxu0 }
 0x518   :  { %v2612_v11 = vsel %vm97_vm1, %v2240_v33, 0.0  ;;  %v3291_v34 = vpop.f32.mrb[29].mxu0  ;;  %v2996_v33 = vld [vmem:[%s4067_s7] ss:$0 sm:$0xff] }
 0x519   :  { %v2613_v36 = vadd.f32 %v2612_v11, %v2611_v32 }
 0x51b   :  { %v2313_v37 = vpop.f32.mrb[24].mxu1 }
 0x51c   :  { %v2614_v38 = vsel %vm97_vm1, %v2313_v37, 0.0  ;;  %v3296_v41 = vpop.f32.mrb[25].mxu1 }
 0x51d   :  { %v2615_v42 = vadd.f32 %v2614_v38, %v2613_v36  ;;  %v2779_v41 = vld [vmem:[%s4070_s10 + $0x30] sm:$0xff] }
 0x51f   :  { %v2630_v44 = vadd.f32 %v2994_v40, %v2615_v42  ;;  %v2386_v46 = vpop.f32.mrb[30].mxu0  ;;  %v2780_v42 = vld [vmem:[%s4070_s10 + $0x38] sm:$0xff] }
 0x520   :  { %v2616_v47 = vsel %vm97_vm1, %v2386_v46, 0.0  ;;  %v2459_v49 = vpop.f32.mrb[26].mxu1  ;;  %v3301_v50 = vpop.f32.mrb[31].mxu0  ;;  %v2997_v46 = vld [vmem:[%s4069_s9] ss:$0 sm:$0xff]  ;;  %s3523_s9 = smov [#allocation4]  }
 0x521   :  { %v2617_v52 = vsel %vm97_vm1, %v2459_v49, 0.0  ;;  %v3306_v54 = vpop.f32.mrb[27].mxu1  ;;  %v2632_v51 = vadd.f32 %v2630_v44, %v3654_v18  ;;  %v3415_v44 = vpack.c.bf16 %v2780_v42, %v2779_v41  ;;  %s2935_s10 = sshll.u32 %s3523_s9, 4  ;;  %s2936_s10 = int_to_ptr.vmem [resolvable:$true] %s2935_s10 }
 0x522   :  { %v2618_v53 = vadd.f32 %v2617_v52, %v2616_v47  ;;  %p3474_p1 = scmp.lt.s32.totalorder %s2936_s10, %s2936_s10 }
 0x523   :  { %v2636_v55 = vsel %vm97_vm1, %v2632_v51, 0.0  ;;  %3416 = vmatprep.subr.bf16.mxu1 %v3415_v44 }
 0x524   :  { %2637 = vadd.xlane.f32.xlu0 %v2636_v55  ;;  %3418 = vmatpush3.bf16.msra.mxu1 %v3415_v44 }
 0x527   :  { %v2532_v56 = vpop.f32.mrb[32].mxu0 }
 0x528   :  { %v2619_v57 = vsel %vm97_vm1, %v2532_v56, 0.0  ;;  %v2605_v58 = vpop.f32.mrb[28].mxu1  ;;  %v3311_v59 = vpop.f32.mrb[33].mxu0 }
 0x529   :  { %v2620_v60 = vadd.f32 %v2619_v57, %v2618_v53  ;;  %v3316_v61 = vpop.f32.mrb[29].mxu1  ;;  %v2621_v62 = vsel %vm97_vm1, %v2605_v58, 0.0  ;;  %v3000_v53 = vld [vmem:[%s4071_s11] ss:$0 sm:$0xff]  ;;  %s3469_s11 = scalar_lea.vmem %s2936_s10, 1024 }
 0x52a   :  { %p3470_p0 = scmp.ne.s32.totalorder %s2936_s10, %s3469_s11  ;;  %p3475_p2 = scmp.lt.s32.totalorder %s3469_s11, %s3469_s11 }
 0x52b   :  { %v2622_v63 = vadd.f32 %v2621_v62, %v2620_v60 }
 0x52c   :  { %p3476_p3 = por %p3475_p2, %p3474_p1 }
 0x52d   :  { %v2631_v0 = vadd.f32 %v2994_v40, %v2622_v63 }
 0x52e   :  { %p3477_p4 = pnand %p3476_p3, %p3470_p0 }
 0x52f   :  { %v2633_v31 = vadd.f32 %v2631_v0, %v3695_v27  ;;  %v2679_v27 = vld [vmem:[%s4068_s8] sm:$0xff] }
 0x530   :  { %v3395_v7 = vpack.c.bf16 %v2680_v48, %v2679_v27 }
 0x531   :  { %v2639_v1 = vsel %vm97_vm1, %v2633_v31, 0.0 }
 0x532   :  { %2640 = vadd.xlane.f32.xlu1 %v2639_v1  ;;  %3396 = vmatprep.subr.bf16.mxu0 %v3395_v7 }
 0x533   :  { %3398 = vmatpush3.bf16.msra.mxu0 %v3395_v7 }
 0x534   :  { %3400 = vmatprep.subr.bf16.mxu0 %v3399_v10 }
 0x537   :  { %3402 = vmatpush3.bf16.msra.mxu0 %v3399_v10 }
 0x5b1   :  { %v2638_v18 = vpop.xlane.xlu0 %2637 }
 0x5b2   :  { %v2643_v39 = vmul.f32 0.03125, %v2638_v18 }
 0x5b4   :  { %v2645_v2 = vsub.f32 %v2632_v51, %v2643_v39 }
 0x5b6   :  { %v2647_v35 = vmul.f32 %v2645_v2, %v2645_v2 }
 0x5b8   :  { %v2649_v3 = vsel %vm97_vm1, %v2647_v35, 0.0 }
 0x5b9   :  { %2650 = vadd.xlane.f32.xlu0 %v2649_v3 }
 0x5bf   :  { %v2641_v43 = vpop.xlane.xlu1 %2640 }
 0x5c0   :  { %v2644_v4 = vmul.f32 0.03125, %v2641_v43 }
 0x5c2   :  { %v2646_v5 = vsub.f32 %v2633_v31, %v2644_v4 }
 0x5c4   :  { %v2648_v45 = vmul.f32 %v2646_v5, %v2646_v5 }
 0x5c6   :  { %v2652_v6 = vsel %vm97_vm1, %v2648_v45, 0.0 }
 0x5c7   :  { %2653 = vadd.xlane.f32.xlu0 %v2652_v6 }
 0x646   :  { %v2651_v22 = vpop.xlane.xlu0 %2650 }
 0x647   :  { %v2655_v23 = vmul.f32 0.03125, %v2651_v22 }
 0x649   :  { %v2657_v24 = vadd.f32 1e-05, %v2655_v23 }
 0x64b   :  { %3461 = vrsqrt.f32 %v2657_v24 }
 0x654   :  { %v2654_v25 = vpop.xlane.xlu0 %2653 }
 0x655   :  { %v3462_v26 = vpop.eup %3461  ;;  %v2656_v28 = vmul.f32 0.03125, %v2654_v25 }
 0x656   :  { %v2661_v30 = vmul.f32 %v3462_v26, %v2645_v2 }
 0x657   :  { %v2658_v32 = vadd.f32 1e-05, %v2656_v28 }
 0x658   :  { %v2669_v11 = vmul.f32 %v2995_v29, %v2661_v30 }
 0x659   :  { %3463 = vrsqrt.f32 %v2658_v32 }
 0x65a   :  { %v2677_v34 = vadd.f32 %v2996_v33, %v2669_v11 }
 0x65c   :  { %3325 = vmatprep.mubr.msk.f32.mxu0 %vm97_vm1, %v2677_v34 }
 0x663   :  { %v3464_v36 = vpop.eup %3463 }
 0x664   :  { %v2662_v37 = vmul.f32 %v3464_v36, %v2646_v5 }
 0x666   :  { %v2670_v38 = vmul.f32 %v2995_v29, %v2662_v37 }
 0x668   :  { %v2678_v40 = vadd.f32 %v2996_v33, %v2670_v38 }
 0x66a   :  { %3326 = vmatmul.mubr.msk.f32.vlgmr.msra.gmra.mrb[34].mxu0 %vm97_vm1, %v2678_v40 }
 0x73d   :  { %v3327_v47 = vpop.f32.mrb[34].mxu0 }
 0x73e   :  { %v2768_v49 = vadd.f32 %v3327_v47, %v2997_v46  ;;  %v2762_v50 = vpop.f32.mrb[35].mxu0 }
 0x73f   :  { %v2763_v52 = vadd.f32 %v2997_v46, %v2762_v50 }
 0x740   :  { %v2772_v51 = vmax.f32 %v2768_v49, 0.0 }
 0x741   :  { %v2771_v54 = vmax.f32 %v2763_v52, 0.0 }
 0x743   :  { %3344 = vmatprep.mubr.msk.f32.mxu1 %vm2788_vm7, %v2771_v54 }
 0x744   :  { %3345 = vmatmul.mubr.msk.f32.vlgmr.msra.gmra.mrb[30].mxu1 %vm2788_vm7, %v2772_v51 }
 0x817   :  { %v3346_v55 = vpop.f32.mrb[30].mxu1 }
 0x818   :  { %v2867_v56 = vadd.f32 %v3346_v55, %v3000_v53  ;;  %v2861_v57 = vpop.f32.mrb[31].mxu1 }
 0x819   :  { %v2862_v58 = vadd.f32 %v3000_v53, %v2861_v57 }
 0x81a   :  { %v2871_v59 = vadd.f32 %v2867_v56, %v2678_v40 }
 0x81b   :  { %v2870_v60 = vadd.f32 %v2862_v58, %v2677_v34 }
 0x81c   :  { %v2877_v61 = vsel %vm97_vm1, %v2871_v59, 0.0 }
 0x81d   :  { %2878 = vadd.xlane.f32.xlu0 %v2877_v61  ;;  %v2874_v62 = vsel %vm97_vm1, %v2870_v60, 0.0 }
 0x81e   :  { %2875 = vadd.xlane.f32.xlu1 %v2874_v62 }
 0x8aa   :  { %v2879_v63 = vpop.xlane.xlu0 %2878 }
 0x8ab   :  { %v2881_v0 = vmul.f32 0.03125, %v2879_v63  ;;  %v2876_v31 = vpop.xlane.xlu1 %2875 }
 0x8ac   :  { %v2880_v1 = vmul.f32 0.03125, %v2876_v31 }
 0x8ad   :  { %v2883_v18 = vsub.f32 %v2871_v59, %v2881_v0 }
 0x8ae   :  { %v2882_v39 = vsub.f32 %v2870_v60, %v2880_v1 }
 0x8af   :  { %v2885_v2 = vmul.f32 %v2883_v18, %v2883_v18 }
 0x8b0   :  { %v2884_v35 = vmul.f32 %v2882_v39, %v2882_v39 }
 0x8b1   :  { %v2889_v3 = vsel %vm97_vm1, %v2885_v2, 0.0 }
 0x8b2   :  { %2890 = vadd.xlane.f32.xlu0 %v2889_v3  ;;  %v2886_v43 = vsel %vm97_vm1, %v2884_v35, 0.0 }
 0x8b3   :  { %2887 = vadd.xlane.f32.xlu1 %v2886_v43 }
 0x8b4   :  { %3480 = shalt.err (!%p3477_p4)
}
 0x8b5   :  { %s3481_s1 = scalar_lea.hbm %s4075_s15, 1024 }
 0x8b6   :  { %p3482_p5 = scmp.ne.s32.totalorder %s4075_s15, %s3481_s1  ;;  %p3485_p6 = scmp.lt.u32.totalorder %s3481_s1, %s4075_s15 }
 0x8b8   :  { %p3487_p7 = pnand %p3485_p6, %p3482_p5 }
 0x8ba   :  { %3490 = shalt.err (!%p3487_p7)
}
 0x8bb   :  { %s3524_s22 = smov 128   ;;  %s3525_s8 = smov 8   ;;  %v3003_v8 = vld [vmem:[%s4072_s12] ss:$0 sm:$0xff] }
 0x8bc   :  { %2941 = dma.vmem_to_hbm [thread:$0]  %s2936_s10, 1024, %s4075_s15, [#allocation5], %s3524_s22, %s3524_s22, %s3525_s8  }
 0x8bd   :  { %v3004_v12 = vld [vmem:[%s4073_s13] ss:$0 sm:$0xff]  ;;  %s3526_s15 = smov [#allocation2]  }
 0x8be   :  { %s2923_s26 = sshll.u32 %s3526_s15, 4  ;;  %s2924_s26 = int_to_ptr.vmem [resolvable:$true] %s2923_s26 }
 0x8bf   :  { %s3491_s27 = scalar_lea.vmem %s2924_s26, 256  ;;  %p3496_p9 = scmp.lt.s32.totalorder %s2924_s26, %s2924_s26 }
 0x8c0   :  { %p3492_p8 = scmp.ne.s32.totalorder %s2924_s26, %s3491_s27  ;;  %p3497_p10 = scmp.lt.s32.totalorder %s3491_s27, %s3491_s27 }
 0x8c2   :  { %p3498_p11 = por %p3497_p10, %p3496_p9 }
 0x8c4   :  { %p3499_p12 = pnand %p3498_p11, %p3492_p8 }
 0x93f   :  { %v2891_v4 = vpop.xlane.xlu0 %2890 }
 0x940   :  { %v2893_v5 = vmul.f32 0.03125, %v2891_v4  ;;  %v2888_v45 = vpop.xlane.xlu1 %2887 }
 0x941   :  { %v2892_v6 = vmul.f32 0.03125, %v2888_v45 }
 0x942   :  { %v2895_v27 = vadd.f32 1e-05, %v2893_v5 }
 0x943   :  { %v2894_v48 = vadd.f32 1e-05, %v2892_v6 }
 0x944   :  { %3465 = vrsqrt.f32 %v2895_v27 }
 0x945   :  { %3467 = vrsqrt.f32 %v2894_v48 }
 0x94e   :  { %v3466_v7 = vpop.eup %3465 }
 0x94f   :  { %v3468_v9 = vpop.eup %3467  ;;  %v2899_v10 = vmul.f32 %v3466_v7, %v2883_v18 }
 0x950   :  { %v2898_v13 = vmul.f32 %v3468_v9, %v2882_v39 }
 0x951   :  { %v2907_v14 = vmul.f32 %v3003_v8, %v2899_v10 }
 0x952   :  { %v2906_v15 = vmul.f32 %v3003_v8, %v2898_v13 }
 0x953   :  { %v2915_v16 = vadd.f32 %v3004_v12, %v2907_v14 }
 0x954   :  { %v2914_v17 = vadd.f32 %v3004_v12, %v2906_v15 }
 0x955   :  { %2917 = vst.msk [vmem:[#allocation2 + $0x8] sm:$0xff] %vm97_vm1, %v2915_v16 }
 0x956   :  { %2916 = vst.msk [vmem:[#allocation2] sm:$0xff] %vm97_vm1, %v2914_v17 }
 0x957   :  { %3502 = shalt.err (!%p3499_p12)
}
 0x958   :  { %s3503_s28 = scalar_lea.hbm %s4074_s14, 256 }
 0x959   :  { %p3504_p13 = scmp.ne.s32.totalorder %s4074_s14, %s3503_s28  ;;  %p3507_p0 = scmp.lt.u32.totalorder %s3503_s28, %s4074_s14 }
 0x95b   :  { %p3509_p1 = pnand %p3507_p0, %p3504_p13 }
 0x95d   :  { %3512 = shalt.err (!%p3509_p1)
}
 0x95e   :  { %2929 = dma.vmem_to_hbm [thread:$0]  %s2924_s26, 256, %s4074_s14, [#allocation3], %s3524_s22, %s3524_s22, %s3525_s8  }
 0x95f   :  { %3513 = dma.done.wait [#allocation3], 256  }
 0x960   :  { %3514 = vsyncadd [#allocation3], 4294967040 }
 0x961   :  { %3515 = dma.done.wait [#allocation5], 1024  }
 0x962   :  { %3516 = vsyncadd [#allocation5], 4294966272 }
 0x963   :  { %2948 = vsyncpa [#allocation3], 1 }
 0x964   :  { %2949 = vsyncpa [#allocation5], 1 }

</bundles_post_ra>
